<compile_context>
chip_gen: v7x
topology: tpu7x:2x2x1
jax: 0.10.0
libtpu: 0.0.40
codegen_flags: <defaults>
</compile_context>

<pallas_src>
import functools

import jax
import jax.numpy as jnp
from jax import lax
from jax.experimental import pallas as pl
from jax.experimental.pallas import tpu as pltpu


def self_attn_kernel(xq_ref, xkv_ref, wqt_ref, bq_ref, wkvt_ref, bkv_ref,
                     gamma_ref, out_ref, q_sc, m_sc, l_sc, acc_sc,
                     *, softmax_bf16):
    ki = pl.program_id(2)
    nk = pl.num_programs(2)
    C = q_sc.shape[-1]  # (possibly padded) channel count

    # ---- init (once per (batch, query-tile)): project Q, reset softmax state.
    @pl.when(ki == 0)
    def _init():
        xq = xq_ref[0].astype(jnp.bfloat16)                            # (TQ, C)
        q = jnp.dot(xq, wqt_ref[...],
                    preferred_element_type=jnp.float32) + bq_ref[...]  # (TQ, C) f32
        q_sc[...] = q.astype(jnp.bfloat16)
        m_sc[...] = jnp.full_like(m_sc, -jnp.inf)
        l_sc[...] = jnp.zeros_like(l_sc)
        acc_sc[...] = jnp.zeros_like(acc_sc)

    # ---- per key tile: fused K/V projection from the single bf16 key tile.
    xkv = xkv_ref[0]                                                   # (TK, C) bf16
    kv = (jnp.dot(xkv, wkvt_ref[...],
                  preferred_element_type=jnp.float32)
          + bkv_ref[...]).astype(jnp.bfloat16)                         # (TK, 2C)
    k_t = kv[:, :C]                                                    # (TK, C)
    v_t = kv[:, C:]                                                    # (TK, C)

    # ---- scores: contract last dim of both operands (flash orientation).
    s = lax.dot_general(q_sc[...], k_t,
                        dimension_numbers=(((1,), (1,)), ((), ())),
                        preferred_element_type=jnp.float32)            # (TQ, TK)

    # ---- online softmax update (f32 stats; exp in bf16 on v6e/v7x).
    m_prev = m_sc[...]
    m_new = jnp.maximum(m_prev, jnp.max(s, axis=-1, keepdims=True))
    alpha = jnp.exp(m_prev - m_new)                                    # (TQ, 1)
    if softmax_bf16:
        p = jnp.exp((s - m_new).astype(jnp.bfloat16))                  # (TQ, TK) bf16
        l_sc[...] = alpha * l_sc[...] + jnp.sum(
            p.astype(jnp.float32), axis=-1, keepdims=True)
        p_mm = p
    else:
        p = jnp.exp(s - m_new)                                         # (TQ, TK) f32
        l_sc[...] = alpha * l_sc[...] + jnp.sum(p, axis=-1, keepdims=True)
        p_mm = p.astype(jnp.bfloat16)
    acc_sc[...] = alpha * acc_sc[...] + jnp.dot(
        p_mm, v_t, preferred_element_type=jnp.float32)                 # (TQ, C)
    m_sc[...] = m_new

    # ---- finalize: normalize once, residual add, store lane-dense (C, TQ).
    @pl.when(ki == nk - 1)
    def _finalize():
        gamma = gamma_ref[0]
        inv_l = pl.reciprocal(l_sc[...], approx=True)                  # (TQ, 1)
        o_t = gamma * (acc_sc[...] * inv_l) + xq_ref[0]                # (TQ, C) f32
        out_ref[0] = o_t.T.astype(out_ref.dtype)                       # (C, TQ)


def _tpu_generation():
    try:
        kind = jax.devices()[0].device_kind.lower()
    except Exception:
        return None
    if "v5" in kind:
        return 5
    if "v6" in kind:
        return 6
    if "7" in kind:
        return 7
    return None


def self_attn_pallas(x, wq, bq, wk, bk, wv, bv, gamma, *,
                     tq=None, tk=None, vmem_limit_bytes=None,
                     softmax_bf16=None, pad_c_multiple=8):
    """x: (B, C, W, H) float32; wq/wk/wv: (C, C); bq/bk/bv: (C,); gamma: (1,)."""
    B, C, W, H = x.shape
    N = W * H
    gen = _tpu_generation()

    # Per-generation defaults (see review): v5e/v6e have 128 MiB VMEM -> big
    # tiles to cut key re-streaming; v7x has 64 MiB + 3.2 TB/s HBM -> smaller
    # tiles and a conservative VMEM request; bf16 EUP exp only on v6e/v7x.
    if gen == 5:
        tq_d, tk_d, vmem_d, bf16exp_d = 512, 1024, 100 << 20, False
    elif gen == 6:
        tq_d, tk_d, vmem_d, bf16exp_d = 512, 512, 100 << 20, True
    elif gen == 7:
        tq_d, tk_d, vmem_d, bf16exp_d = 256, 512, 52 << 20, True
    else:
        tq_d, tk_d, vmem_d, bf16exp_d = 256, 512, 64 << 20, False

    user_tq = tq is not None
    if tq is None:
        tq = min(tq_d, N)
    if tk is None:
        tk = min(tk_d, N)
    if vmem_limit_bytes is None:
        vmem_limit_bytes = vmem_d
    if softmax_bf16 is None:
        softmax_bf16 = bf16exp_d

    # v7x megacore: keep the number of parallel blocks even so neither
    # TensorCore idles on the tail.
    if gen == 7 and not user_tq:
        while ((B * (N // tq)) % 2 == 1 and tq % 2 == 0
               and (tq // 2) % 128 == 0 and N % (tq // 2) == 0):
            tq //= 2

    # TODO(synk): ragged N (W*H not a multiple of the tile sizes) would need a
    # masked tail path or N-padding; not implemented.
    assert N % tq == 0 and N % tk == 0, "W*H must be divisible by tile sizes"
    assert tq == N or tq % 128 == 0, "tq must be a multiple of 128 (or == N)"
    assert tk == N or tk % 8 == 0, "tk must be a multiple of 8 (or == N)"

    # Channel padding (exact: zero weights / zero bias / zero residual).
    Cp = ((C + pad_c_multiple - 1) // pad_c_multiple) * pad_c_multiple

    def pad2(a):
        return jnp.pad(a, ((0, Cp - a.shape[0]), (0, Cp - a.shape[1])))

    def pad1(a):
        return jnp.pad(a, (0, Cp - a.shape[0]))

    x_flat = x.reshape(B, C, N)
    x_t = jnp.transpose(x_flat, (0, 2, 1))                    # (B, N, C) f32
    if Cp != C:
        x_t = jnp.pad(x_t, ((0, 0), (0, 0), (0, Cp - C)))
    x_t_bf16 = x_t.astype(jnp.bfloat16)                       # key/value stream

    wqt = pad2(wq.T).astype(jnp.bfloat16)                     # (Cp, Cp)
    bq_p = pad1(bq).reshape(1, Cp).astype(jnp.float32)
    wkvt = jnp.concatenate([pad2(wk.T), pad2(wv.T)],
                           axis=1).astype(jnp.bfloat16)       # (Cp, 2Cp)
    bkv_p = jnp.concatenate([pad1(bk), pad1(bv)]).reshape(1, 2 * Cp).astype(jnp.float32)

    grid = (B, N // tq, N // tk)

    key_idx = lambda b, qi, ki: (b, ki, 0)
    if gen == 5:
        # Deeper key pipeline to hide DMA jitter on low-bandwidth v5e.
        try:
            key_spec = pl.BlockSpec((1, tk, Cp), key_idx,
                                    pipeline_mode=pl.Buffered(3))
        except TypeError:
            key_spec = pl.BlockSpec((1, tk, Cp), key_idx)
    else:
        key_spec = pl.BlockSpec((1, tk, Cp), key_idx)

    kernel = functools.partial(self_attn_kernel, softmax_bf16=softmax_bf16)

    out_flat = pl.pallas_call(
        kernel,
        out_shape=jax.ShapeDtypeStruct((B, Cp, N), x.dtype),
        grid_spec=pltpu.PrefetchScalarGridSpec(
            num_scalar_prefetch=0,
            grid=grid,
            in_specs=[
                pl.BlockSpec((1, tq, Cp), lambda b, qi, ki: (b, qi, 0)),  # query tile / residual (f32)
                key_spec,                                                  # key/value tile (bf16)
                pl.BlockSpec((Cp, Cp), lambda b, qi, ki: (0, 0)),          # wq^T (bf16)
                pl.BlockSpec((1, Cp), lambda b, qi, ki: (0, 0)),           # bq (f32)
                pl.BlockSpec((Cp, 2 * Cp), lambda b, qi, ki: (0, 0)),      # [wk^T | wv^T] (bf16)
                pl.BlockSpec((1, 2 * Cp), lambda b, qi, ki: (0, 0)),       # [bk | bv] (f32)
                pl.BlockSpec(memory_space=pltpu.MemorySpace.SMEM),         # gamma
            ],
            out_specs=pl.BlockSpec((1, Cp, tq), lambda b, qi, ki: (b, 0, qi)),
            scratch_shapes=[
                pltpu.VMEM((tq, Cp), jnp.bfloat16),   # Q tile (projected once per query tile)
                pltpu.VMEM((tq, 1), jnp.float32),     # m (running max)
                pltpu.VMEM((tq, 1), jnp.float32),     # l (running denom)
                pltpu.VMEM((tq, Cp), jnp.float32),    # acc
            ],
        ),
        compiler_params=pltpu.CompilerParams(
            dimension_semantics=("parallel", "parallel", "arbitrary"),
            vmem_limit_bytes=vmem_limit_bytes,
        ),
    )(x_t, x_t_bf16, wqt, bq_p, wkvt, bkv_p, gamma)

    if Cp != C:
        out_flat = out_flat[:, :C, :]
    return out_flat.reshape(B, C, W, H)


def self_attn_ref(x, wq, bq, wk, bk, wv, bv, gamma):
    """Pure-JAX f32 reference mirroring the PyTorch forward pass."""
    B, C, W, H = x.shape
    N = W * H
    xf = x.reshape(B, C, N)
    q = jnp.einsum('oc,bcn->bon', wq, xf) + bq[None, :, None]
    k = jnp.einsum('oc,bcn->bon', wk, xf) + bk[None, :, None]
    v = jnp.einsum('oc,bcn->bon', wv, xf) + bv[None, :, None]
    energy = jnp.einsum('bci,bcj->bij', q, k)          # (B, N, N)
    att = jax.nn.softmax(energy, axis=-1)
    out = jnp.einsum('bcj,bij->bci', v, att)           # (B, C, N)
    out = gamma[0] * out + xf
    return out.reshape(B, C, W, H)


if __name__ == "__main__":
    B, C, W, H = 2, 4, 16, 16
    key = jax.random.PRNGKey(0)
    kx, kq, kbq, kk, kbk, kv, kbv = jax.random.split(key, 7)

    x = jax.random.normal(kx, (B, C, W, H), dtype=jnp.float32)

    # 1x1 conv params: nn.Conv2d weight (C, C, 1, 1) squeezed to (C, C), bias (C,).
    wq = 0.1 * jax.random.normal(kq, (C, C), dtype=jnp.float32)
    bq = 0.1 * jax.random.normal(kbq, (C,), dtype=jnp.float32)
    wk = 0.1 * jax.random.normal(kk, (C, C), dtype=jnp.float32)
    bk = 0.1 * jax.random.normal(kbk, (C,), dtype=jnp.float32)
    wv = 0.1 * jax.random.normal(kv, (C, C), dtype=jnp.float32)
    bv = 0.1 * jax.random.normal(kbv, (C,), dtype=jnp.float32)
    # Module inits gamma to 0 (out == x); use nonzero so the attention path is
    # actually exercised.
    gamma = jnp.array([0.5], dtype=jnp.float32)

    # tq=tk=128 so the test exercises both query tiling and the online-softmax
    # key loop (N = 256 -> 2 query tiles x 2 key tiles), plus channel padding
    # (C=4 -> Cp=8).
    out = self_attn_pallas(x, wq, bq, wk, bk, wv, bv, gamma, tq=128, tk=128)
    out = jax.block_until_ready(out)

    ref = self_attn_ref(x, wq, bq, wk, bk, wv, bv, gamma)
    assert out.shape == (B, C, W, H)
    # bf16 MXU operands (f32 accumulation) -> relaxed tolerance vs f32 reference.
    err = float(jnp.max(jnp.abs(out - ref)))
    assert jnp.allclose(out, ref, atol=2e-2, rtol=2e-2), \
        f"mismatch: max abs diff {err}"

    print("KERNEL_OK")
</pallas_src>

<mosaic_0001>
module attributes {stable_mosaic.version = 11 : i64} {
  func.func @self_attn_kernel(%arg0: i32, %arg1: i32, %arg2: i32, %arg3: memref<1x128x8xf32, #tpu.memory_space<vmem>>, %arg4: memref<1x128x8xbf16, #tpu.memory_space<vmem>>, %arg5: memref<8x8xbf16, #tpu.memory_space<vmem>>, %arg6: memref<1x8xf32, #tpu.memory_space<vmem>>, %arg7: memref<8x16xbf16, #tpu.memory_space<vmem>>, %arg8: memref<1x16xf32, #tpu.memory_space<vmem>>, %arg9: memref<1xf32, #tpu.memory_space<smem>>, %arg10: memref<1x8x128xf32, #tpu.memory_space<vmem>>, %arg11: memref<128x8xbf16, #tpu.memory_space<vmem>>, %arg12: memref<128x1xf32, #tpu.memory_space<vmem>>, %arg13: memref<128x1xf32, #tpu.memory_space<vmem>>, %arg14: memref<128x8xf32, #tpu.memory_space<vmem>>) attributes {dimension_semantics = [#tpu.dimension_semantics<parallel>, #tpu.dimension_semantics<parallel>, #tpu.dimension_semantics<arbitrary>], iteration_bounds = array<i64: 2, 2, 2>, scalar_prefetch = 0 : i64, scratch_operands = 4 : i64, tpu.core_type = #tpu.core_type<tc>, window_params = [{transform_indices = @transform_0, window_bounds = array<i64: 1, 128, 8>}, {transform_indices = @transform_1, window_bounds = array<i64: 1, 128, 8>}, {pipeline_mode = #tpu.pipeline_mode<synchronous>, transform_indices = @transform_2, window_bounds = array<i64: 8, 8>}, {pipeline_mode = #tpu.pipeline_mode<synchronous>, transform_indices = @transform_3, window_bounds = array<i64: 1, 8>}, {pipeline_mode = #tpu.pipeline_mode<synchronous>, transform_indices = @transform_4, window_bounds = array<i64: 8, 16>}, {pipeline_mode = #tpu.pipeline_mode<synchronous>, transform_indices = @transform_5, window_bounds = array<i64: 1, 16>}, {transform_indices = @transform_6, window_bounds = array<i64: 1>}, {transform_indices = @transform_7, window_bounds = array<i64: 1, 8, 128>}]} {
    %c0_i32 = arith.constant 0 : i32
    %0 = arith.cmpi eq, %arg2, %c0_i32 : i32
    %1 = arith.extui %0 : i1 to i32
    %c0_i32_0 = arith.constant 0 : i32
    %2 = arith.cmpi ne, %1, %c0_i32_0 : i32
    scf.if %2 {
      %c0_26 = arith.constant 0 : index
      %c0_27 = arith.constant 0 : index
      %c0_28 = arith.constant 0 : index
      %41 = vector.load %arg3[%c0_26, %c0_27, %c0_28] : memref<1x128x8xf32, #tpu.memory_space<vmem>>, vector<1x128x8xf32>
      %42 = vector.shape_cast %41 : vector<1x128x8xf32> to vector<128x8xf32>
      %43 = arith.truncf %42 : vector<128x8xf32> to vector<128x8xbf16>
      %c0_29 = arith.constant 0 : index
      %c0_30 = arith.constant 0 : index
      %44 = vector.load %arg5[%c0_29, %c0_30] : memref<8x8xbf16, #tpu.memory_space<vmem>>, vector<8x8xbf16>
      %cst_31 = arith.constant dense<0.000000e+00> : vector<128x8xf32>
      %45 = tpu.matmul %43, %44, %cst_31 {dimension_numbers = #tpu.dot_dimension_numbers<[1], [0], [0], [1], [0, 0, 1, 1], [], []>} : vector<128x8xbf16>, vector<8x8xbf16>, vector<128x8xf32> -> vector<128x8xf32>
      %c0_32 = arith.constant 0 : index
      %c0_33 = arith.constant 0 : index
      %46 = vector.load %arg6[%c0_32, %c0_33] : memref<1x8xf32, #tpu.memory_space<vmem>>, vector<1x8xf32>
      %47 = vector.broadcast %46 : vector<1x8xf32> to vector<128x8xf32>
      %48 = arith.addf %45, %47 : vector<128x8xf32>
      %49 = arith.truncf %48 : vector<128x8xf32> to vector<128x8xbf16>
      %c0_34 = arith.constant 0 : index
      %c0_35 = arith.constant 0 : index
      %50 = vector.load %arg11[%c0_34, %c0_35] : memref<128x8xbf16, #tpu.memory_space<vmem>>, vector<128x8xbf16>
      tpu.vector_store %arg11[%c0_34, %c0_35], %49 {strides = array<i32>} : memref<128x8xbf16, #tpu.memory_space<vmem>>, vector<128x8xbf16>,
      %cst_36 = arith.constant 0xFF800000 : f32
      %51 = vector.broadcast %cst_36 : f32 to vector<128x1xf32>
      %c0_37 = arith.constant 0 : index
      %c0_38 = arith.constant 0 : index
      %52 = vector.load %arg12[%c0_37, %c0_38] : memref<128x1xf32, #tpu.memory_space<vmem>>, vector<128x1xf32>
      tpu.vector_store %arg12[%c0_37, %c0_38], %51 {strides = array<i32>} : memref<128x1xf32, #tpu.memory_space<vmem>>, vector<128x1xf32>,
      %cst_39 = arith.constant 0.000000e+00 : f32
      %53 = vector.broadcast %cst_39 : f32 to vector<128x1xf32>
      %c0_40 = arith.constant 0 : index
      %c0_41 = arith.constant 0 : index
      %54 = vector.load %arg13[%c0_40, %c0_41] : memref<128x1xf32, #tpu.memory_space<vmem>>, vector<128x1xf32>
      tpu.vector_store %arg13[%c0_40, %c0_41], %53 {strides = array<i32>} : memref<128x1xf32, #tpu.memory_space<vmem>>, vector<128x1xf32>,
      %cst_42 = arith.constant 0.000000e+00 : f32
      %55 = vector.broadcast %cst_42 : f32 to vector<128x8xf32>
      %c0_43 = arith.constant 0 : index
      %c0_44 = arith.constant 0 : index
      %56 = vector.load %arg14[%c0_43, %c0_44] : memref<128x8xf32, #tpu.memory_space<vmem>>, vector<128x8xf32>
      tpu.vector_store %arg14[%c0_43, %c0_44], %55 {strides = array<i32>} : memref<128x8xf32, #tpu.memory_space<vmem>>, vector<128x8xf32>,
    } else {
    }
    %c0 = arith.constant 0 : index
    %c0_1 = arith.constant 0 : index
    %c0_2 = arith.constant 0 : index
    %3 = vector.load %arg4[%c0, %c0_1, %c0_2] : memref<1x128x8xbf16, #tpu.memory_space<vmem>>, vector<1x128x8xbf16>
    %4 = vector.shape_cast %3 : vector<1x128x8xbf16> to vector<128x8xbf16>
    %c0_3 = arith.constant 0 : index
    %c0_4 = arith.constant 0 : index
    %5 = vector.load %arg7[%c0_3, %c0_4] : memref<8x16xbf16, #tpu.memory_space<vmem>>, vector<8x16xbf16>
    %cst = arith.constant dense<0.000000e+00> : vector<128x16xf32>
    %6 = tpu.matmul %4, %5, %cst {dimension_numbers = #tpu.dot_dimension_numbers<[1], [0], [0], [1], [0, 0, 1, 1], [], []>} : vector<128x8xbf16>, vector<8x16xbf16>, vector<128x16xf32> -> vector<128x16xf32>
    %c0_5 = arith.constant 0 : index
    %c0_6 = arith.constant 0 : index
    %7 = vector.load %arg8[%c0_5, %c0_6] : memref<1x16xf32, #tpu.memory_space<vmem>>, vector<1x16xf32>
    %8 = vector.broadcast %7 : vector<1x16xf32> to vector<128x16xf32>
    %9 = arith.addf %6, %8 : vector<128x16xf32>
    %10 = arith.truncf %9 : vector<128x16xf32> to vector<128x16xbf16>
    %11 = vector.extract_strided_slice %10 {offsets = [0, 0], sizes = [128, 8], strides = [1, 1]} : vector<128x16xbf16> to vector<128x8xbf16>
    %12 = vector.extract_strided_slice %10 {offsets = [0, 8], sizes = [128, 8], strides = [1, 1]} : vector<128x16xbf16> to vector<128x8xbf16>
    %c0_7 = arith.constant 0 : index
    %c0_8 = arith.constant 0 : index
    %13 = vector.load %arg11[%c0_7, %c0_8] : memref<128x8xbf16, #tpu.memory_space<vmem>>, vector<128x8xbf16>
    %cst_9 = arith.constant dense<0.000000e+00> : vector<128x128xf32>
    %14 = tpu.matmul %13, %11, %cst_9 {dimension_numbers = #tpu.dot_dimension_numbers<[1], [1], [0], [0], [0, 0, 1, 0], [], []>} : vector<128x8xbf16>, vector<128x8xbf16>, vector<128x128xf32> -> vector<128x128xf32>
    %c0_10 = arith.constant 0 : index
    %c0_11 = arith.constant 0 : index
    %15 = vector.load %arg12[%c0_10, %c0_11] : memref<128x1xf32, #tpu.memory_space<vmem>>, vector<128x1xf32>
    %cst_12 = arith.constant dense<0xFF800000> : vector<128xf32>
    %16 = vector.multi_reduction <maximumf>, %14, %cst_12 [1] : vector<128x128xf32> to vector<128xf32>
    %17 = vector.shape_cast %16 : vector<128xf32> to vector<128x1xf32>
    %18 = arith.maximumf %15, %17 : vector<128x1xf32>
    %19 = arith.subf %15, %18 : vector<128x1xf32>
    %20 = math.exp %19 : vector<128x1xf32>
    %21 = vector.broadcast %18 : vector<128x1xf32> to vector<128x128xf32>
    %22 = arith.subf %14, %21 : vector<128x128xf32>
    %23 = math.exp %22 : vector<128x128xf32>
    %c0_13 = arith.constant 0 : index
    %c0_14 = arith.constant 0 : index
    %24 = vector.load %arg13[%c0_13, %c0_14] : memref<128x1xf32, #tpu.memory_space<vmem>>, vector<128x1xf32>
    %25 = arith.mulf %20, %24 : vector<128x1xf32>
    %cst_15 = arith.constant dense<0.000000e+00> : vector<128xf32>
    %26 = vector.multi_reduction <add>, %23, %cst_15 [1] : vector<128x128xf32> to vector<128xf32>
    %27 = vector.shape_cast %26 : vector<128xf32> to vector<128x1xf32>
    %28 = arith.addf %25, %27 : vector<128x1xf32>
    %c0_16 = arith.constant 0 : index
    %c0_17 = arith.constant 0 : index
    %29 = vector.load %arg13[%c0_16, %c0_17] : memref<128x1xf32, #tpu.memory_space<vmem>>, vector<128x1xf32>
    tpu.vector_store %arg13[%c0_16, %c0_17], %28 {strides = array<i32>} : memref<128x1xf32, #tpu.memory_space<vmem>>, vector<128x1xf32>,
    %30 = arith.truncf %23 : vector<128x128xf32> to vector<128x128xbf16>
    %c0_18 = arith.constant 0 : index
    %c0_19 = arith.constant 0 : index
    %31 = vector.load %arg14[%c0_18, %c0_19] : memref<128x8xf32, #tpu.memory_space<vmem>>, vector<128x8xf32>
    %32 = vector.broadcast %20 : vector<128x1xf32> to vector<128x8xf32>
    %33 = arith.mulf %32, %31 : vector<128x8xf32>
    %cst_20 = arith.constant dense<0.000000e+00> : vector<128x8xf32>
    %34 = tpu.matmul %30, %12, %cst_20 {dimension_numbers = #tpu.dot_dimension_numbers<[1], [0], [0], [1], [0, 0, 1, 1], [], []>} : vector<128x128xbf16>, vector<128x8xbf16>, vector<128x8xf32> -> vector<128x8xf32>
    %35 = arith.addf %33, %34 : vector<128x8xf32>
    %c0_21 = arith.constant 0 : index
    %c0_22 = arith.constant 0 : index
    %36 = vector.load %arg14[%c0_21, %c0_22] : memref<128x8xf32, #tpu.memory_space<vmem>>, vector<128x8xf32>
    tpu.vector_store %arg14[%c0_21, %c0_22], %35 {strides = array<i32>} : memref<128x8xf32, #tpu.memory_space<vmem>>, vector<128x8xf32>,
    %c0_23 = arith.constant 0 : index
    %c0_24 = arith.constant 0 : index
    %37 = vector.load %arg12[%c0_23, %c0_24] : memref<128x1xf32, #tpu.memory_space<vmem>>, vector<128x1xf32>
    tpu.vector_store %arg12[%c0_23, %c0_24], %18 {strides = array<i32>} : memref<128x1xf32, #tpu.memory_space<vmem>>, vector<128x1xf32>,
    %c1_i32 = arith.constant 1 : i32
    %38 = arith.cmpi eq, %arg2, %c1_i32 : i32
    %39 = arith.extui %38 : i1 to i32
    %c0_i32_25 = arith.constant 0 : i32
    %40 = arith.cmpi ne, %39, %c0_i32_25 : i32
    scf.if %40 {
      %c0_26 = arith.constant 0 : index
      %41 = memref.load %arg9[%c0_26] : memref<1xf32, #tpu.memory_space<smem>>
      %c0_27 = arith.constant 0 : index
      %c0_28 = arith.constant 0 : index
      %42 = vector.load %arg13[%c0_27, %c0_28] : memref<128x1xf32, #tpu.memory_space<vmem>>, vector<128x1xf32>
      %43 = tpu.reciprocal %42 {approx = true} : vector<128x1xf32> -> vector<128x1xf32>
      %c0_29 = arith.constant 0 : index
      %c0_30 = arith.constant 0 : index
      %44 = vector.load %arg14[%c0_29, %c0_30] : memref<128x8xf32, #tpu.memory_space<vmem>>, vector<128x8xf32>
      %45 = vector.broadcast %43 : vector<128x1xf32> to vector<128x8xf32>
      %46 = arith.mulf %44, %45 : vector<128x8xf32>
      %47 = vector.broadcast %41 : f32 to vector<128x8xf32>
      %48 = arith.mulf %47, %46 : vector<128x8xf32>
      %c0_31 = arith.constant 0 : index
      %c0_32 = arith.constant 0 : index
      %c0_33 = arith.constant 0 : index
      %49 = vector.load %arg3[%c0_31, %c0_32, %c0_33] : memref<1x128x8xf32, #tpu.memory_space<vmem>>, vector<1x128x8xf32>
      %50 = vector.shape_cast %49 : vector<1x128x8xf32> to vector<128x8xf32>
      %51 = arith.addf %48, %50 : vector<128x8xf32>
      %52 = tpu.transpose %51, [1, 0] : vector<128x8xf32> -> vector<8x128xf32>
      %c0_34 = arith.constant 0 : index
      %c0_35 = arith.constant 0 : index
      %c0_36 = arith.constant 0 : index
      %53 = vector.load %arg10[%c0_34, %c0_35, %c0_36] : memref<1x8x128xf32, #tpu.memory_space<vmem>>, vector<1x8x128xf32>
      %54 = vector.shape_cast %53 : vector<1x8x128xf32> to vector<8x128xf32>
      %55 = vector.shape_cast %52 : vector<8x128xf32> to vector<1x8x128xf32>
      tpu.vector_store %arg10[%c0_34, %c0_35, %c0_36], %55 {strides = array<i32>} : memref<1x8x128xf32, #tpu.memory_space<vmem>>, vector<1x8x128xf32>,
    } else {
    }
    return
  }
  func.func @transform_0(%arg0: i32, %arg1: i32, %arg2: i32) -> (i32, i32, i32) {
    %c0_i32 = arith.constant 0 : i32
    %c0_i32_0 = arith.constant 0 : i32
    return %arg0, %arg1, %c0_i32 : i32, i32, i32
  }
  func.func @transform_1(%arg0: i32, %arg1: i32, %arg2: i32) -> (i32, i32, i32) {
    %c0_i32 = arith.constant 0 : i32
    %c0_i32_0 = arith.constant 0 : i32
    return %arg0, %arg2, %c0_i32 : i32, i32, i32
  }
  func.func @transform_2(%arg0: i32, %arg1: i32, %arg2: i32) -> (i32, i32) {
    %c0_i32 = arith.constant 0 : i32
    %c0_i32_0 = arith.constant 0 : i32
    %c0_i32_1 = arith.constant 0 : i32
    return %c0_i32, %c0_i32_0 : i32, i32
  }
  func.func @transform_3(%arg0: i32, %arg1: i32, %arg2: i32) -> (i32, i32) {
    %c0_i32 = arith.constant 0 : i32
    %c0_i32_0 = arith.constant 0 : i32
    %c0_i32_1 = arith.constant 0 : i32
    return %c0_i32, %c0_i32_0 : i32, i32
  }
  func.func @transform_4(%arg0: i32, %arg1: i32, %arg2: i32) -> (i32, i32) {
    %c0_i32 = arith.constant 0 : i32
    %c0_i32_0 = arith.constant 0 : i32
    %c0_i32_1 = arith.constant 0 : i32
    return %c0_i32, %c0_i32_0 : i32, i32
  }
  func.func @transform_5(%arg0: i32, %arg1: i32, %arg2: i32) -> (i32, i32) {
    %c0_i32 = arith.constant 0 : i32
    %c0_i32_0 = arith.constant 0 : i32
    %c0_i32_1 = arith.constant 0 : i32
    return %c0_i32, %c0_i32_0 : i32, i32
  }
  func.func @transform_6(%arg0: i32, %arg1: i32, %arg2: i32) -> i32 {
    %c0_i32 = arith.constant 0 : i32
    %c0_i32_0 = arith.constant 0 : i32
    return %c0_i32 : i32
  }
  func.func @transform_7(%arg0: i32, %arg1: i32, %arg2: i32) -> (i32, i32, i32) {
    %c0_i32 = arith.constant 0 : i32
    %c0_i32_0 = arith.constant 0 : i32
    return %arg0, %c0_i32, %arg1 : i32, i32, i32
  }
}

</mosaic_0001>

<bundles_post_ra>
// kernel: tpu_custom_call.1
= control target key start
LH: loop header
LB: loop body
LE: loop exit
PB: predicated region body
PF: predicated region fallthrough
CT: control target
= control target key end

     0   :  { %s3960_s0 = inlined_call_operand.hbm [shape: f32[2,256,8], index: 0, kind: input, shape index: {}]   ;;  %s3961_s1 = inlined_call_operand.hbm [shape: bf16[2,256,8], index: 1, kind: input, shape index: {}]   ;;  %s3962_s2 = inlined_call_operand.hbm [shape: bf16[8,8], index: 2, kind: input, shape index: {}]   ;;  %s3963_s3 = inlined_call_operand.hbm [shape: f32[1,8], index: 3, kind: input, shape index: {}]   ;;  %s3964_s4 = inlined_call_operand.hbm [shape: bf16[8,16], index: 4, kind: input, shape index: {}]   ;;  %s3965_s5 = inlined_call_operand.hbm [shape: f32[1,16], index: 5, kind: input, shape index: {}]   ;;  %s3966_s6 = inlined_call_operand.<no memory space> [shape: f32[1], index: 6, kind: input, shape index: {}]   ;;  %s3967_s7 = inlined_call_operand.hbm [shape: f32[2,8,256], index: 7, kind: output, shape index: {}]  }
   0x1   :  { %3982 = sst [smem:[#allocation33_spill]] %s3960_s0 }
   0x2   :  { %3983 = sst [smem:[#allocation34_spill]] %s3962_s2 }
   0x3   :  { %3984 = sst [smem:[#allocation35_spill]] %s3963_s3 }
   0x4   :  { %3985 = sst [smem:[#allocation36_spill]] %s3964_s4 }
   0x5   :  { %3986 = sst [smem:[#allocation37_spill]] %s3965_s5 }
   0x6   :  { %3987 = sst [smem:[#allocation38_spill]] %s3967_s7 }
   0x7   :  { %12 = sst [smem:[#allocation6]] %s3966_s6 }
   0x8   :  { %13 = vsyncpa [#allocation8], 0 }
   0x9   :  { %15 = vsyncpa [#allocation8 + $0x1], 0 }
   0xa   :  { %16 = vsyncpa [#allocation11], 0 }
   0xb   :  { %18 = vsyncpa [#allocation11 + $0x1], 0 }
   0xc   :  { %19 = vsyncpa [#allocation14], 0 }
   0xd   :  { %20 = vsyncpa [#allocation17], 0 }
   0xe   :  { %21 = vsyncpa [#allocation9], 0 }
   0xf   :  { %23 = vsyncpa [#allocation9 + $0x1], 0  ;;  %s2931_s26 = smov 0   ;;  %s2933_s27 = smov 0  }
  0x10   :  { %s2935_s28 = smov 0   ;;  %s2937_s29 = smov 0  }
  0x11   :  { %s2939_s30 = smov 0   ;;  %s2941_s8 = smov 0  }
  0x12   :  { %s2943_s6 = smov 0   ;;  %s2945_s9 = smov 0  }
  0x13   :  { %s2947_s10 = smov 0   ;;  %s2949_s11 = smov 0  }
  0x14   :  { %s2951_s12 = smov 0   ;;  %s2953_s13 = smov 0  }
  0x15   :  { %s2955_s14 = smov 0  }
  0x16 LB: > { %3988 = sst [smem:[#allocation25_spill]] %s2834_s29  ;;  %s2995_s15 = sadd.s32 4294967295, %s2870_s14   ;;  %s2870_s14 = sphi %s2955_s14, %s29_s14   ;;  %s2866_s13 = sphi %s2953_s13, %s4048_s13   ;;  %s2862_s12 = sphi %s2951_s12, %s4047_s12   ;;  %s2858_s11 = sphi %s2949_s11, %s4046_s11   ;;  %s2854_s10 = sphi %s2947_s10, %s4045_s10   ;;  %s2850_s9 = sphi %s2945_s9, %s4044_s9   ;;  %s2846_s6 = sphi %s2943_s6, %s4043_s6   ;;  %s2842_s8 = sphi %s2941_s8, %s4042_s8   ;;  %s2838_s30 = sphi %s2939_s30, %s4041_s30   ;;  %s2834_s29 = sphi %s2937_s29, %s4040_s29   ;;  %s2830_s28 = sphi %s2935_s28, %s4039_s28   ;;  %s2826_s27 = sphi %s2933_s27, %s4038_s27   ;;  %s2822_s26 = sphi %s2931_s26, %s4037_s26  }
  0x17   : > { %3989 = sst [smem:[#allocation26_spill]] %s2846_s6  ;;  %p98_p0 = scmp.ne.s32.totalorder %s2826_s27, %s2822_s26 }
  0x18   : > { %3990 = sst [smem:[#allocation27_spill]] %s2850_s9  ;;  %p3969_p1 = scmp.eq.s32.totalorder %s2995_s15, 0 }
  0x19   : > { %3991 = sst [smem:[#allocation28_spill]] %s2854_s10  ;;  %p2037_p3 = scmp.ge.s32.totalorder %s2870_s14, 1 }
  0x1a   : > { %p242_p4 = scmp.lt.s32.totalorder %s2870_s14, 9  ;;  %p3004_p5 = por %p98_p0, %p3969_p1 }
  0x1b   : > { %s2872_s18 = smov [#allocation12]   ;;  %s2873_s21 = smov [#allocation13]  }
  0x1c   : > { %s3992_s16 = scalar_select %p3004_p5, 1, 0 }
  0x1d   : > { %p3008_p6 = pnand %p2037_p3, %p242_p4  ;;  %s255_s19 = sshll.u32 %s2872_s18, 4  ;;  %s256_s19 = int_to_ptr.vmem [resolvable:$true] %s255_s19 }
  0x1e   : > { %3993 = sst [smem:[#allocation29_spill]] %s3992_s16  ;;  %s266_s22 = sshll.u32 %s2873_s21, 4  ;;  %s3020_s22 = int_to_ptr.vmem [resolvable:$true] %s266_s22 }
  0x1f   : > { %s3994_s17 = scalar_select %p3008_p6, 1, 0 }
  0x20   : > { %p2285_p7 = pneg %p3008_p6  ;;  %s2874_s23 = smov [#allocation15]  }
  0x21   : > { %s277_s24 = sshll.u32 %s2874_s23, 4  ;;  %s3996_s2 = sld [smem:[#allocation34_spill]]  ;;  %s3022_s24 = int_to_ptr.vmem [resolvable:$true] %s277_s24 }
  0x22   : > { %p3016_p8 = pnand %p2285_p7, %p3969_p1 }
  0x24   : > { %p3032_p10 = pneg %p3016_p8 }
  0x27   : > { %s2544_s18 = scalar_lea.hbm %s3996_s2, 64 }
  0x28   : > { %p2545_p9 = scmp.ne.s32.totalorder %s3996_s2, %s2544_s18  ;;  %p2551_p13 = scmp.lt.u32.totalorder %s2544_s18, %s3996_s2 }
  0x2a   : > { %p2547_p11 = pnand %p3032_p10, %p2545_p9 }
  0x2c   : > { %p2548_p12 = pneg %p2547_p11 }
  0x2e   : > { %p2553_p0 = pnand %p2551_p13, %p2548_p12 }
  0x30   : > { %2556 = shalt.err (!%p2553_p0)
}
  0x31   : > { %s2557_s25 = scalar_lea.vmem %s256_s19, 64  ;;  %p2565_p2 = scmp.lt.s32.totalorder %s256_s19, %s256_s19 }
  0x32   : > { %p2558_p3 = scmp.ne.s32.totalorder %s256_s19, %s2557_s25  ;;  %p2566_p1 = scmp.lt.s32.totalorder %s2557_s25, %s2557_s25 }
  0x34   : > { %p2560_p4 = pnand %p2558_p3, %p3032_p10  ;;  %p2567_p5 = por %p2566_p1, %p2565_p2 }
  0x36   : > { %p2561_p7 = pneg %p2560_p4 }
  0x38   : > { %p2568_p6 = pnand %p2567_p5, %p2561_p7 }
  0x3a   : > { %2571 = shalt.err (!%p2568_p6)
}
  0x3b   : > { %2288 = dma.hbm_to_vmem [thread:$0]  (!%p3016_p8), %s3996_s2, 64, %s256_s19, [#allocation11]  }
  0x3c   : > { %s3998_s3 = sld [smem:[#allocation35_spill]] }
  0x42   : > { %s2572_s21 = scalar_lea.hbm %s3998_s3, 16 }
  0x43   : > { %p2573_p9 = scmp.ne.s32.totalorder %s3998_s3, %s2572_s21  ;;  %p2579_p2 = scmp.lt.u32.totalorder %s2572_s21, %s3998_s3 }
  0x45   : > { %p2575_p11 = pnand %p2573_p9, %p3032_p10 }
  0x47   : > { %p2576_p1 = pneg %p2575_p11 }
  0x49   : > { %p2581_p5 = pnand %p2579_p2, %p2576_p1 }
  0x4b   : > { %2584 = shalt.err (!%p2581_p5)
}
  0x4c   : > { %s2585_s19 = scalar_lea.vmem %s3020_s22, 16  ;;  %s2592_s6 = scalar_lea.vmem %s3020_s22, 32 }
  0x4d   : > { %p2586_p6 = scmp.ne.s32.totalorder %s3020_s22, %s2585_s19  ;;  %p2593_p0 = scmp.lt.s32.totalorder %s3020_s22, %s3020_s22 }
  0x4e   : > { %p2594_p3 = scmp.lt.s32.totalorder %s2592_s6, %s2585_s19 }
  0x4f   : > { %p2588_p12 = pnand %p2586_p6, %p3032_p10 }
  0x50   : > { %p2595_p4 = por %p2594_p3, %p2593_p0 }
  0x51   : > { %p2589_p13 = pneg %p2588_p12 }
  0x53   : > { %p2596_p7 = pnand %p2595_p4, %p2589_p13 }
  0x55   : > { %2599 = shalt.err (!%p2596_p7)
}
  0x56   : > { %2291 = dma.hbm_to_vmem [thread:$0]  (!%p3016_p8), %s3998_s3, 16, %s3020_s22, [#allocation14]  }
  0x57   : > { %s3999_s4 = sld [smem:[#allocation36_spill]] }
  0x5d   : > { %s2600_s18 = scalar_lea.hbm %s3999_s4, 64 }
  0x5e   : > { %p2601_p9 = scmp.ne.s32.totalorder %s3999_s4, %s2600_s18  ;;  %p2607_p2 = scmp.lt.u32.totalorder %s2600_s18, %s3999_s4 }
  0x60   : > { %p2603_p11 = pnand %p2601_p9, %p3032_p10 }
  0x62   : > { %p2604_p1 = pneg %p2603_p11 }
  0x64   : > { %p2609_p5 = pnand %p2607_p2, %p2604_p1 }
  0x66   : > { %2612 = shalt.err (!%p2609_p5)
}
  0x67   : > { %s2613_s22 = scalar_lea.vmem %s3022_s24, 64  ;;  %p2621_p0 = scmp.lt.s32.totalorder %s3022_s24, %s3022_s24 }
  0x68   : > { %p2614_p6 = scmp.ne.s32.totalorder %s3022_s24, %s2613_s22  ;;  %p2622_p3 = scmp.lt.s32.totalorder %s2613_s22, %s2613_s22 }
  0x6a   : > { %p2616_p12 = pnand %p2614_p6, %p3032_p10  ;;  %p2623_p4 = por %p2622_p3, %p2621_p0 }
  0x6c   : > { %p2617_p13 = pneg %p2616_p12 }
  0x6e   : > { %p2624_p7 = pnand %p2623_p4, %p2617_p13 }
  0x70   : > { %2627 = shalt.err (!%p2624_p7)
}
  0x71   : > { %2294 = dma.hbm_to_vmem [thread:$0]  (!%p3016_p8), %s3999_s4, 64, %s3022_s24, [#allocation14]  }
  0x72   : > { %s2875_s7 = smov [#allocation16]   ;;  %s4000_s5 = sld [smem:[#allocation37_spill]] }
  0x73   : > { %s288_s9 = sshll.u32 %s2875_s7, 4  ;;  %s289_s9 = int_to_ptr.vmem [resolvable:$true] %s288_s9 }
  0x78   : > { %s2628_s21 = scalar_lea.hbm %s4000_s5, 16 }
  0x79   : > { %p2629_p9 = scmp.ne.s32.totalorder %s4000_s5, %s2628_s21  ;;  %p2635_p2 = scmp.lt.u32.totalorder %s2628_s21, %s4000_s5 }
  0x7b   : > { %p2631_p11 = pnand %p2629_p9, %p3032_p10 }
  0x7d   : > { %p2632_p1 = pneg %p2631_p11 }
  0x7f   : > { %p2637_p5 = pnand %p2635_p2, %p2632_p1 }
  0x81   : > { %2640 = shalt.err (!%p2637_p5)
}
  0x82   : > { %s2641_s24 = scalar_lea.vmem %s289_s9, 16  ;;  %s2648_s6 = scalar_lea.vmem %s289_s9, 32 }
  0x83   : > { %p2642_p6 = scmp.ne.s32.totalorder %s289_s9, %s2641_s24  ;;  %p2649_p0 = scmp.lt.s32.totalorder %s289_s9, %s289_s9 }
  0x84   : > { %p2650_p3 = scmp.lt.s32.totalorder %s2648_s6, %s2641_s24 }
  0x85   : > { %p2644_p12 = pnand %p2642_p6, %p3032_p10 }
  0x86   : > { %p2651_p4 = por %p2650_p3, %p2649_p0 }
  0x87   : > { %p2645_p13 = pneg %p2644_p12 }
  0x89   : > { %p2652_p7 = pnand %p2651_p4, %p2645_p13 }
  0x8b   : > { %2655 = shalt.err (!%p2652_p7)
}
  0x8c   : > { %2297 = dma.hbm_to_vmem [thread:$0]  (!%p3016_p8), %s4000_s5, 16, %s289_s9, [#allocation17]  }
  0x8d   : > { %s2036_s10 = sadd.s32 4294967294, %s2870_s14   ;;  %s41_s20 = sadd.s32 1, %s2858_s11 }
  0x8e   : > { %s44_s26 = sadd.s32 1, %s2862_s12  ;;  %p42_p10 = scmp.ge.s32.totalorder %s41_s20, 2 }
  0x8f   : > { %s48_s18 = sadd.s32 1, %s2866_s13  ;;  %s57_s21 = sadd.s32 1, %s2842_s8 }
  0x90   : > { %p64_p9 = scmp.ne.s32.totalorder %s2842_s8, %s2838_s30  ;;  %s4050_s20 = smov (%p42_p10, %s41_s20), 0 }
  0x91   : > { %4001 = sst [smem:[#allocation30_spill]] %s4050_s20  ;;  %s4052_s26 = smov (!%p42_p10, %s44_s26), %s2862_s12 }
  0x92   : > { %p3980_p11 = scmp.eq.s32.totalorder %s2870_s14, 0  ;;  %p70_p8 = scmp.ne.s32.totalorder %s2838_s30, %s2834_s29 }
  0x93   : > { %p46_p1 = scmp.ge.s32.totalorder %s4052_s26, 2  ;;  %s81_s9 = ssub.s32 %s2858_s11, %s4050_s20 }
  0x94   : > { %p3130_p2 = por %p3980_p11, %p64_p9  ;;  %p4003_p5 = scmp.eq.s32.totalorder %s2995_s15, 0 }
  0x95   : > { %s4054_s26 = smov (%p46_p1, %s4052_s26), 0  ;;  %s4056_s18 = smov (!%p46_p1, %s48_s18), %s2866_s13 }
  0x96   : > { %p3139_p6 = por %p4003_p5, %p70_p8  ;;  %4005 = sst [smem:[#allocation31_spill]] %s4054_s26 }
  0x97   : > { %s53_s19 = ssub.s32 %s2862_s12, %s4054_s26  ;;  %p4006_p12 = scmp.eq.s32.totalorder %s2995_s15, 7 }
  0x98   : > { %p50_p0 = scmp.ge.s32.totalorder %s4056_s18, 2  ;;  %p235_p3 = scmp.eq.s32.totalorder %s2036_s10, 7 }
  0x99   : > { %p3150_p13 = por %p4006_p12, %p64_p9  ;;  %p3979_p4 = scmp.lt.s32.totalorder %s2870_s14, 8 }
  0x9a   : > { %s302_s24 = sand.u32 1, %s2842_s8   ;;  %s4058_s18 = smov (%p50_p0, %s4056_s18), 0 }
  0x9b   : > { %s4007_s22 = scalar_select %p3150_p13, 1, 0 }
  0x9c   : > { %p3161_p7 = por %p235_p3, %p70_p8  ;;  %s52_s16 = ssub.s32 %s2866_s13, %s4058_s18 }
  0x9d   : > { %4008 = sst [smem:[#allocation32_spill]] %s4007_s22  ;;  %s2043_s7 = sshll.u32 %s302_s24, 7 }
  0x9e   : > { %s4009_s6 = scalar_select %p3161_p7, 1, 0 }
  0x9f   : > { %s54_s2 = sor.u32 %s53_s19, %s52_s16  ;;  %s3167_s3 = sor.u32 %s81_s9, %s52_s16 }
  0xa0   : > { %p55_p10 = scmp.eq.s32.totalorder %s54_s2, 0  ;;  %s2044_s10 = sshll.u32 %s2862_s12, 4 }
  0xa1   : > { %s2045_s5 = sshll.u32 %s2866_s13, 5  ;;  %s306_s26 = scalar_lea.vmem [#allocation7], %s2043_s7 }
  0xa2   : > { %s3172_s4 = scalar_select %p55_p10, %s2842_s8, %s57_s21  }
  0xa3   : > { %s315_s20 = sshll.u32 %s306_s26, 4  ;;  %s312_s29 = sadd.s32 %s2045_s5, %s2044_s10  ;;  %s3177_s20 = int_to_ptr.vmem [resolvable:$true] %s315_s20 }
  0xa4   : > { %s2046_s22 = sshll.u32 %s312_s29, 7  ;;  %p3183_p8 = pnand %p3979_p4, %p3130_p2 }
  0xa5   : > { %s4011_s0 = sld [smem:[#allocation33_spill]]  ;;  %s3192_s26 = scalar_lea.sflag [#allocation8], %s302_s24 }
  0xa6   : > { %p2658_p2 = pneg %p3183_p8 }
  0xab   : > { %s3190_s21 = scalar_lea.hbm %s4011_s0, %s2046_s22  ;;  %s2661_s7 = scalar_lea.hbm %s4011_s0, 8192 }
  0xac   : > { %s2656_s29 = scalar_lea.hbm %s3190_s21, 2048  ;;  %p2662_p0 = scmp.lt.u32.totalorder %s3190_s21, %s4011_s0 }
  0xad   : > { %p2657_p1 = scmp.ne.s32.totalorder %s3190_s21, %s2656_s29  ;;  %p2663_p3 = scmp.lt.u32.totalorder %s2661_s7, %s2656_s29 }
  0xae   : > { %p2665_p4 = scmp.lt.u32.totalorder %s2656_s29, %s3190_s21 }
  0xaf   : > { %p2659_p5 = pnand %p2658_p2, %p2657_p1  ;;  %p2664_p10 = por %p2663_p3, %p2662_p0 }
  0xb1   : > { %p2660_p12 = pneg %p2659_p5  ;;  %p2666_p11 = por %p2665_p4, %p2664_p10 }
  0xb3   : > { %p2667_p9 = pnand %p2666_p11, %p2660_p12 }
  0xb5   : > { %2670 = shalt.err (!%p2667_p9)
}
  0xb6   : > { %s2671_s24 = scalar_lea.vmem %s3177_s20, 2048  ;;  %s2876_s9 = smov [#allocation7]  }
  0xb7   : > { %p2672_p1 = scmp.ne.s32.totalorder %s3177_s20, %s2671_s24  ;;  %s2676_s2 = sshll.u32 %s2876_s9, 4  ;;  %s2677_s2 = int_to_ptr.vmem [resolvable:$false] %s2676_s2 }
  0xb8   : > { %s2678_s23 = scalar_lea.vmem %s2677_s2, 4096  ;;  %p2679_p13 = scmp.lt.s32.totalorder %s3177_s20, %s2677_s2 }
  0xb9   : > { %p2674_p5 = pnand %p2672_p1, %p2658_p2  ;;  %p2680_p0 = scmp.lt.s32.totalorder %s2678_s23, %s2671_s24 }
  0xbb   : > { %p2675_p7 = pneg %p2674_p5  ;;  %p2681_p3 = por %p2680_p0, %p2679_p13 }
  0xbd   : > { %p2682_p4 = pnand %p2681_p3, %p2675_p7 }
  0xbf   : > { %2685 = shalt.err (!%p2682_p4)
}
  0xc0   : > { %s2877_s29 = smov 128   ;;  %s2878_s16 = smov 8  }
  0xc1   : > { %2301 = dma.hbm_to_vmem [thread:$0]  (!%p3183_p8), %s3190_s21, 2048, %s3177_s20, %s3192_s26, %s2877_s29, %s2877_s29, %s2878_s16  }
  0xc2   : > { %s2048_s7 = sshll.u32 %s2858_s11, 4  ;;  %s85_s24 = sadd.s32 1, %s2830_s28 }
  0xc3   : > { %s335_s22 = sadd.s32 %s2048_s7, %s2045_s5  ;;  %p92_p11 = scmp.ne.s32.totalorder %s2830_s28, %s2826_s27 }
  0xc4   : > { %s2050_s10 = sshll.u32 %s335_s22, 6  ;;  %p4012_p13 = scmp.eq.s32.totalorder %s3167_s3, 0 }
  0xc5   : > { %s3227_s23 = scalar_lea.hbm %s3961_s1, %s2050_s10  ;;  %p4013_p7 = scmp.eq.s32.totalorder %s2870_s14, 0 }
  0xc6   : > { %s3234_s0 = scalar_select %p4012_p13, %s2830_s28, %s85_s24  }
  0xc7   : > { %p94_p9 = por %p92_p11, %p4013_p7  ;;  %s325_s20 = sand.u32 1, %s2870_s14  }
  0xc8   : > { %s327_s19 = sand.u32 1, %s2830_s28   ;;  %p4014_p8 = scmp.lt.s32.totalorder %s2870_s14, 8 }
  0xc9   : > { %s2047_s5 = sshll.u32 %s327_s19, 6  ;;  %s3248_s3 = scalar_lea.sflag [#allocation11], %s325_s20 }
  0xca   : > { %p3242_p2 = pnand %p4014_p8, %p94_p9  ;;  %s329_s26 = scalar_lea.vmem [#allocation10], %s2047_s5 }
  0xcb   : > { %s338_s29 = sshll.u32 %s329_s26, 4  ;;  %s2686_s16 = scalar_lea.hbm %s3227_s23, 1024  ;;  %s3246_s29 = int_to_ptr.vmem [resolvable:$true] %s338_s29 }
  0xcc   : > { %p2687_p12 = scmp.ne.s32.totalorder %s3227_s23, %s2686_s16  ;;  %p2688_p10 = pneg %p3242_p2 }
  0xcd   : > { %s2691_s10 = scalar_lea.hbm %s3961_s1, 4096  ;;  %p2692_p0 = scmp.lt.u32.totalorder %s3227_s23, %s3961_s1 }
  0xce   : > { %p2689_p1 = pnand %p2688_p10, %p2687_p12  ;;  %p2693_p3 = scmp.lt.u32.totalorder %s2691_s10, %s2686_s16 }
  0xcf   : > { %p2695_p11 = scmp.lt.u32.totalorder %s2686_s16, %s3227_s23 }
  0xd0   : > { %p2690_p5 = pneg %p2689_p1  ;;  %p2694_p4 = por %p2693_p3, %p2692_p0 }
  0xd2   : > { %p2696_p13 = por %p2695_p11, %p2694_p4 }
  0xd4   : > { %p2697_p7 = pnand %p2696_p13, %p2690_p5 }
  0xd6   : > { %2700 = shalt.err (!%p2697_p7)
}
  0xd7   : > { %s2701_s2 = scalar_lea.vmem %s3246_s29, 1024  ;;  %s2879_s20 = smov [#allocation10]  }
  0xd8   : > { %p2702_p9 = scmp.ne.s32.totalorder %s3246_s29, %s2701_s2  ;;  %s2706_s19 = sshll.u32 %s2879_s20, 4  ;;  %s2707_s19 = int_to_ptr.vmem [resolvable:$false] %s2706_s19 }
  0xd9   : > { %s2708_s5 = scalar_lea.vmem %s2707_s19, 2048  ;;  %p2709_p1 = scmp.lt.s32.totalorder %s3246_s29, %s2707_s19 }
  0xda   : > { %p2704_p8 = pnand %p2702_p9, %p2688_p10  ;;  %p2710_p0 = scmp.lt.s32.totalorder %s2708_s5, %s2701_s2 }
  0xdc   : > { %p2705_p12 = pneg %p2704_p8  ;;  %p2711_p3 = por %p2710_p0, %p2709_p1 }
  0xde   : > { %p2712_p4 = pnand %p2711_p3, %p2705_p12 }
  0xe0   : > { %2715 = shalt.err (!%p2712_p4)
}
  0xe1   : > { %s2880_s26 = smov 64   ;;  %s2881_s16 = smov 4  }
  0xe2   : > { %2304 = dma.hbm_to_vmem [thread:$0]  (!%p3242_p2), %s3227_s23, 1024, %s3246_s29, %s3248_s3, %s2880_s26, %s2880_s26, %s2881_s16  }
  0xe3   : > { %p4016_p10 = scmp.ne.s32.totalorder %s3994_s17, 0 }
  0xe4   : > { %s3279_s7 = sand.u32 (!%p4016_p10), 1, %s2838_s30  }
  0xe5   : > { %350 = sbr.rel (%p4016_p10) target bundleno = 1822 (0x71e), region = 48  ;;  %s2052_s22 = sshll.u32 (!%p4016_p10), %s3279_s7, 7 }
  0xe6   : > { %s353_s10 = scalar_lea.sflag (!%p4016_p10), [#allocation8], %s3279_s7  ;;  %s3283_s24 = scalar_lea.vmem (!%p4016_p10), [#allocation7], %s2052_s22 }
  0xec   : > { %2797 = dma.done.wait (%p3139_p6), %s353_s10, 2048  }
  0xed   : > { %2799 = vsyncadd (%p3139_p6), %s353_s10, 4294965248  ;;  %s4017_s23 = sld [smem:[#allocation29_spill]]  ;;  %s361_s17 = sand.u32 1, %s2995_s15  }
  0xee   : > { %s363_s21 = sand.u32 1, %s2826_s27   ;;  %s362_s3 = scalar_lea.sflag [#allocation11], %s361_s17 }
  0xef   : > { %s2053_s29 = sshll.u32 %s363_s21, 6 }
  0xf0   : > { %s3291_s9 = scalar_lea.vmem [#allocation10], %s2053_s29 }
  0xf3   : > { %p4018_p2 = scmp.ne.s32.totalorder %s4017_s23, 0 }
  0xf5   : > { %2801 = dma.done.wait (%p4018_p2), %s362_s3, 1024  }
  0xf6   : > { %2803 = vsyncadd (%p4018_p2), %s362_s3, 4294966272  ;;  %p4019_p5 = scmp.eq.s32.totalorder %s2995_s15, 0 }
  0xf8   : > { %2805 = dma.done.wait (%p4019_p5), [#allocation11], 64   ;;  %p4020_p11 = pmov %p4019_p5 }
  0xf9   : > { %p4021_p6 = pmov %p4019_p5 }
  0xfa   : > { %2807 = vsyncadd (%p4020_p11), [#allocation11], 4294967232 }
  0xfb   : > { %2809 = dma.done.wait (%p4021_p6), [#allocation14], 80   ;;  %p4022_p13 = pmov %p4019_p5 }
  0xfc   : > { %p4023_p7 = pmov %p4019_p5 }
  0xfd   : > { %2811 = vsyncadd (%p4022_p13), [#allocation14], 4294967216 }
  0xfe   : > { %2813 = dma.done.wait (%p4023_p7), [#allocation17], 16   ;;  %p4024_p9 = pmov %p4019_p5 }
  0xff   : > { %s2058_s25 = sshll.u32 %s3279_s7, 3  ;;  %s4025_s20 = sld [smem:[#allocation26_spill]] }
 0x100   : > { %2815 = vsyncadd (%p4024_p9), [#allocation17], 4294967280  ;;  %s3310_s2 = scalar_lea.vmem [#allocation18], %s2058_s25 }
 0x105   : > { %p2059_p8 = scmp.ne.s32.totalorder %s4025_s20, 0 }
 0x106   : > { %v448_v0 = vld [vmem:[#allocation12] sm:$0xf] (!%p2059_p8)  ;;  %vm481_vm0 = vcmask (!%p2059_p8), 1043456   ;;  %v425_v2 = vld [vmem:[%s3283_s24 + $0x8] sm:$0xff] (!%p2059_p8)  ;;  %vm456_vm1 = vcmask (!%p2059_p8), 64512   ;;  %vm598_vm2 = vcmask (!%p2059_p8), 7168  }
 0x107   : > { %423 = sbr.rel (%p2059_p8) target bundleno = 496 (0x1f0), region = 76  ;;  %v424_v1 = vld [vmem:[%s3283_s24] sm:$0xff] (!%p2059_p8)  ;;  %2252 = vmatprep.subr.msk.bf16.mxu0 (!%p2059_p8), %vm481_vm0, %v448_v0  ;;  %2253 = vmatprep.subr.msk.bf16.mxu1 (!%p2059_p8), %vm481_vm0, %v448_v0  ;;  %v483_v3 = vsel (!%p2059_p8), %vm481_vm0, %v448_v0, 0  ;;  %v3319_v6 = vld [vmem:[%s3283_s24 + $0x48] sm:$0xff] (!%p2059_p8)  ;;  %v3322_v7 = vld [vmem:[%s3283_s24 + $0x10] sm:$0xff] (!%p2059_p8)  ;;  %v2882_v8 = vmov (!%p2059_p8), -inf  }
 0x108   : > { %v440_v4 = vpack.c.bf16 (!%p2059_p8), %v425_v2, %v424_v1  ;;  %v3316_v5 = vld [vmem:[%s3283_s24 + $0x40] sm:$0xff] (!%p2059_p8)  ;;  %2151 = vmatpush3.bf16.msra.mxu0 (!%p2059_p8), %v483_v3  ;;  %2251 = vmatpush3.bf16.msra.mxu1 (!%p2059_p8), %v483_v3  ;;  %599 = vst.msk [vmem:[#allocation3] sm:$0xff] (!%p2059_p8), %vm598_vm2, %v2882_v8  ;;  %600 = vst.msk [vmem:[#allocation3 + $0x8] sm:$0xff] (!%p2059_p8), %vm598_vm2, %v2882_v8  ;;  %v427_v10 = vld [vmem:[%s3283_s24 + $0x18] sm:$0xff] (!%p2059_p8)  ;;  %v2883_v13 = vmov (!%p2059_p8), 0.0  }
 0x109   : > { %601 = vst.msk [vmem:[#allocation3 + $0x10] sm:$0xff] (!%p2059_p8), %vm598_vm2, %v2882_v8  ;;  %602 = vst.msk [vmem:[#allocation3 + $0x18] sm:$0xff] (!%p2059_p8), %vm598_vm2, %v2882_v8  ;;  %v444_v9 = vpack.c.bf16 (!%p2059_p8), %v3319_v6, %v3316_v5  ;;  %v434_v11 = vld [vmem:[%s3283_s24 + $0x50] sm:$0xff] (!%p2059_p8)  ;;  %v435_v12 = vld [vmem:[%s3283_s24 + $0x58] sm:$0xff] (!%p2059_p8)  ;;  %v441_v14 = vpack.c.bf16 (!%p2059_p8), %v427_v10, %v3322_v7 }
 0x10a   : > { %603 = vst.msk [vmem:[#allocation3 + $0x20] sm:$0xff] (!%p2059_p8), %vm598_vm2, %v2882_v8  ;;  %604 = vst.msk [vmem:[#allocation3 + $0x28] sm:$0xff] (!%p2059_p8), %vm598_vm2, %v2882_v8  ;;  %2152 = vmatprep.mubr.msk.bf16.mxu0 (!%p2059_p8), %vm456_vm1, %v440_v4  ;;  %v445_v15 = vpack.c.bf16 (!%p2059_p8), %v435_v12, %v434_v11  ;;  %v428_v16 = vld [vmem:[%s3283_s24 + $0x20] sm:$0xff] (!%p2059_p8)  ;;  %v429_v17 = vld [vmem:[%s3283_s24 + $0x28] sm:$0xff] (!%p2059_p8) }
 0x10b   : > { %605 = vst.msk [vmem:[#allocation3 + $0x30] sm:$0xff] (!%p2059_p8), %vm598_vm2, %v2882_v8  ;;  %606 = vst.msk [vmem:[#allocation3 + $0x38] sm:$0xff] (!%p2059_p8), %vm598_vm2, %v2882_v8  ;;  %v436_v18 = vld [vmem:[%s3283_s24 + $0x60] sm:$0xff] (!%p2059_p8)  ;;  %2160 = vmatprep.mubr.msk.bf16.mxu1 (!%p2059_p8), %vm456_vm1, %v444_v9  ;;  %v442_v19 = vpack.c.bf16 (!%p2059_p8), %v429_v17, %v428_v16  ;;  %v437_v20 = vld [vmem:[%s3283_s24 + $0x68] sm:$0xff] (!%p2059_p8)  ;;  %2153 = vmatmul.mubr.msk.bf16.vlgmr.msra.gmra.mrb[0].mxu0 (!%p2059_p8), %vm456_vm1, %v441_v14 }
 0x10c   : > { %607 = vst.msk [vmem:[#allocation3 + $0x40] sm:$0xff] (!%p2059_p8), %vm598_vm2, %v2882_v8  ;;  %608 = vst.msk [vmem:[#allocation3 + $0x48] sm:$0xff] (!%p2059_p8), %vm598_vm2, %v2882_v8  ;;  %2161 = vmatmul.mubr.msk.bf16.vlgmr.msra.gmra.mrb[0].mxu1 (!%p2059_p8), %vm456_vm1, %v445_v15  ;;  %v446_v21 = vpack.c.bf16 (!%p2059_p8), %v437_v20, %v436_v18  ;;  %v430_v22 = vld [vmem:[%s3283_s24 + $0x30] sm:$0xff] (!%p2059_p8)  ;;  %v431_v23 = vld [vmem:[%s3283_s24 + $0x38] sm:$0xff] (!%p2059_p8) }
 0x10d   : > { %609 = vst.msk [vmem:[#allocation3 + $0x50] sm:$0xff] (!%p2059_p8), %vm598_vm2, %v2882_v8  ;;  %610 = vst.msk [vmem:[#allocation3 + $0x58] sm:$0xff] (!%p2059_p8), %vm598_vm2, %v2882_v8  ;;  %2156 = vmatprep.mubr.msk.bf16.mxu0 (!%p2059_p8), %vm456_vm1, %v442_v19  ;;  %v438_v24 = vld [vmem:[%s3283_s24 + $0x70] sm:$0xff] (!%p2059_p8)  ;;  %v439_v25 = vld [vmem:[%s3283_s24 + $0x78] sm:$0xff] (!%p2059_p8)  ;;  %v443_v26 = vpack.c.bf16 (!%p2059_p8), %v431_v23, %v430_v22 }
 0x10e   : > { %611 = vst.msk [vmem:[#allocation3 + $0x60] sm:$0xff] %vm598_vm2, %v2882_v8  ;;  %612 = vst.msk [vmem:[#allocation3 + $0x68] sm:$0xff] %vm598_vm2, %v2882_v8  ;;  %2164 = vmatprep.mubr.msk.bf16.mxu1 %vm456_vm1, %v446_v21  ;;  %v447_v27 = vpack.c.bf16 %v439_v25, %v438_v24  ;;  %v2060_v29 = vld [vmem:[#allocation13] ss:$0 sm:$0xff] }
 0x10f   : > { %613 = vst.msk [vmem:[#allocation3 + $0x70] sm:$0xff] %vm598_vm2, %v2882_v8  ;;  %614 = vst.msk [vmem:[#allocation3 + $0x78] sm:$0xff] %vm598_vm2, %v2882_v8 }
 0x110   : > { %615 = vst.msk [vmem:[#allocation4] sm:$0xff] %vm598_vm2, %v2883_v13  ;;  %616 = vst.msk [vmem:[#allocation4 + $0x8] sm:$0xff] %vm598_vm2, %v2883_v13 }
 0x111   : > { %617 = vst.msk [vmem:[#allocation4 + $0x10] sm:$0xff] %vm598_vm2, %v2883_v13  ;;  %618 = vst.msk [vmem:[#allocation4 + $0x18] sm:$0xff] %vm598_vm2, %v2883_v13 }
 0x112   : > { %619 = vst.msk [vmem:[#allocation4 + $0x20] sm:$0xff] %vm598_vm2, %v2883_v13  ;;  %620 = vst.msk [vmem:[#allocation4 + $0x28] sm:$0xff] %vm598_vm2, %v2883_v13 }
 0x113   : > { %621 = vst.msk [vmem:[#allocation4 + $0x30] sm:$0xff] %vm598_vm2, %v2883_v13  ;;  %622 = vst.msk [vmem:[#allocation4 + $0x38] sm:$0xff] %vm598_vm2, %v2883_v13  ;;  %2157 = vmatmul.mubr.msk.bf16.gmra.mrb[4].mxu0 %vm456_vm1, %v443_v26 }
 0x114   : > { %623 = vst.msk [vmem:[#allocation4 + $0x40] sm:$0xff] %vm598_vm2, %v2883_v13  ;;  %624 = vst.msk [vmem:[#allocation4 + $0x48] sm:$0xff] %vm598_vm2, %v2883_v13  ;;  %2165 = vmatmul.mubr.msk.bf16.gmra.mrb[4].mxu1 %vm456_vm1, %v447_v27 }
 0x115   : > { %625 = vst.msk [vmem:[#allocation4 + $0x50] sm:$0xff] %vm598_vm2, %v2883_v13  ;;  %626 = vst.msk [vmem:[#allocation4 + $0x58] sm:$0xff] %vm598_vm2, %v2883_v13 }
 0x116   : > { %627 = vst.msk [vmem:[#allocation4 + $0x60] sm:$0xff] %vm598_vm2, %v2883_v13  ;;  %628 = vst.msk [vmem:[#allocation4 + $0x68] sm:$0xff] %vm598_vm2, %v2883_v13 }
 0x117   : > { %629 = vst.msk [vmem:[#allocation4 + $0x70] sm:$0xff] %vm598_vm2, %v2883_v13  ;;  %630 = vst.msk [vmem:[#allocation4 + $0x78] sm:$0xff] %vm598_vm2, %v2883_v13 }
 0x118   : > { %631 = vst.msk [vmem:[#allocation5] sm:$0xff] %vm456_vm1, %v2883_v13  ;;  %632 = vst.msk [vmem:[#allocation5 + $0x8] sm:$0xff] %vm456_vm1, %v2883_v13 }
 0x119   : > { %633 = vst.msk [vmem:[#allocation5 + $0x10] sm:$0xff] %vm456_vm1, %v2883_v13  ;;  %634 = vst.msk [vmem:[#allocation5 + $0x18] sm:$0xff] %vm456_vm1, %v2883_v13 }
 0x11a   : > { %635 = vst.msk [vmem:[#allocation5 + $0x20] sm:$0xff] %vm456_vm1, %v2883_v13  ;;  %636 = vst.msk [vmem:[#allocation5 + $0x28] sm:$0xff] %vm456_vm1, %v2883_v13 }
 0x11b   : > { %637 = vst.msk [vmem:[#allocation5 + $0x30] sm:$0xff] %vm456_vm1, %v2883_v13  ;;  %638 = vst.msk [vmem:[#allocation5 + $0x38] sm:$0xff] %vm456_vm1, %v2883_v13 }
 0x11c   : > { %639 = vst.msk [vmem:[#allocation5 + $0x40] sm:$0xff] %vm456_vm1, %v2883_v13  ;;  %640 = vst.msk [vmem:[#allocation5 + $0x48] sm:$0xff] %vm456_vm1, %v2883_v13 }
 0x11d   : > { %641 = vst.msk [vmem:[#allocation5 + $0x50] sm:$0xff] %vm456_vm1, %v2883_v13  ;;  %642 = vst.msk [vmem:[#allocation5 + $0x58] sm:$0xff] %vm456_vm1, %v2883_v13 }
 0x11e   : > { %643 = vst.msk [vmem:[#allocation5 + $0x60] sm:$0xff] %vm456_vm1, %v2883_v13  ;;  %644 = vst.msk [vmem:[#allocation5 + $0x68] sm:$0xff] %vm456_vm1, %v2883_v13 }
 0x11f   : > { %645 = vst.msk [vmem:[#allocation5 + $0x70] sm:$0xff] %vm456_vm1, %v2883_v13  ;;  %646 = vst.msk [vmem:[#allocation5 + $0x78] sm:$0xff] %vm456_vm1, %v2883_v13 }
 0x1de   : > { %v2154_v28 = vpop.f32.mrb[0].mxu0 }
 0x1df   : > { %v2162_v30 = vpop.f32.mrb[0].mxu1  ;;  %v519_v31 = vpop.f32.mrb[1].mxu0  ;;  %v528_v35 = vadd.f32 %v2154_v28, %v2060_v29 }
 0x1e0   : > { %v551_v32 = vpop.f32.mrb[1].mxu1  ;;  %v2155_v33 = vpop.f32.mrb[2].mxu0  ;;  %v560_v36 = vadd.f32 %v2162_v30, %v2060_v29  ;;  %v520_v41 = vadd.f32 %v2060_v29, %v519_v31 }
 0x1e1   : > { %v2163_v34 = vpop.f32.mrb[2].mxu1  ;;  %v531_v37 = vadd.f32 %v2155_v33, %v2060_v29  ;;  %v522_v39 = vpop.f32.mrb[3].mxu0  ;;  %v552_v42 = vadd.f32 %v2060_v29, %v551_v32 }
 0x1e2   : > { %v563_v38 = vadd.f32 %v2163_v34, %v2060_v29  ;;  %v554_v40 = vpop.f32.mrb[3].mxu1  ;;  %v523_v43 = vadd.f32 %v2060_v29, %v522_v39 }
 0x1e3   : > { %v555_v44 = vadd.f32 %v2060_v29, %v554_v40  ;;  %v583_v45 = vpack.c.bf16 %v531_v37, %v528_v35 }
 0x1e4   : > { %v587_v46 = vpack.c.bf16 %v563_v38, %v560_v36  ;;  %v582_v47 = vpack.c.bf16 %v523_v43, %v520_v41 }
 0x1e5   : > { %v586_v48 = vpack.c.bf16 %v555_v44, %v552_v42  ;;  %591 = vst.msk [vmem:[#allocation2 + $0x8] sm:$0xff] %vm456_vm1, %v583_v45 }
 0x1e6   : > { %595 = vst.msk [vmem:[#allocation2 + $0x28] sm:$0xff] %vm456_vm1, %v587_v46  ;;  %590 = vst.msk [vmem:[#allocation2] sm:$0xff] %vm456_vm1, %v582_v47  ;;  %v2158_v49 = vpop.f32.mrb[4].mxu0 }
 0x1e7   : > { %594 = vst.msk [vmem:[#allocation2 + $0x20] sm:$0xff] %vm456_vm1, %v586_v48  ;;  %v2166_v50 = vpop.f32.mrb[4].mxu1  ;;  %v535_v51 = vpop.f32.mrb[5].mxu0  ;;  %v544_v55 = vadd.f32 %v2158_v49, %v2060_v29 }
 0x1e8   : > { %v567_v52 = vpop.f32.mrb[5].mxu1  ;;  %v2159_v53 = vpop.f32.mrb[6].mxu0  ;;  %v576_v56 = vadd.f32 %v2166_v50, %v2060_v29  ;;  %v536_v61 = vadd.f32 %v2060_v29, %v535_v51 }
 0x1e9   : > { %v2167_v54 = vpop.f32.mrb[6].mxu1  ;;  %v547_v57 = vadd.f32 %v2159_v53, %v2060_v29  ;;  %v538_v59 = vpop.f32.mrb[7].mxu0  ;;  %v568_v62 = vadd.f32 %v2060_v29, %v567_v52 }
 0x1ea   : > { %v579_v58 = vadd.f32 %v2167_v54, %v2060_v29  ;;  %v570_v60 = vpop.f32.mrb[7].mxu1  ;;  %v539_v63 = vadd.f32 %v2060_v29, %v538_v59 }
 0x1eb   : > { %v571_v0 = vadd.f32 %v2060_v29, %v570_v60  ;;  %v585_v1 = vpack.c.bf16 %v547_v57, %v544_v55 }
 0x1ec   : > { %v589_v2 = vpack.c.bf16 %v579_v58, %v576_v56  ;;  %v584_v3 = vpack.c.bf16 %v539_v63, %v536_v61 }
 0x1ed   : > { %v588_v4 = vpack.c.bf16 %v571_v0, %v568_v62  ;;  %593 = vst.msk [vmem:[#allocation2 + $0x18] sm:$0xff] %vm456_vm1, %v585_v1 }
 0x1ee   : > { %597 = vst.msk [vmem:[#allocation2 + $0x38] sm:$0xff] %vm456_vm1, %v589_v2  ;;  %592 = vst.msk [vmem:[#allocation2 + $0x10] sm:$0xff] %vm456_vm1, %v584_v3 }
 0x1ef   : > { %596 = vst.msk [vmem:[#allocation2 + $0x30] sm:$0xff] %vm456_vm1, %v588_v4 }
 0x1f0 PF: > { %v663_v5 = vld [vmem:[#allocation15] sm:$0xf]  ;;  %vm736_vm3 = vcmask 1043456   ;;  %vm711_vm4 = vcmask 64512   ;;  %v2440_v9 = vld [vmem:[%s3291_s9 + $0x10] sm:$0xff]   ;;  %v2441_v10 = vld [vmem:[%s3291_s9 + $0x18] sm:$0xff]  }
 0x1f1   : > { %v2438_v6 = vld [vmem:[%s3291_s9] sm:$0xff]   ;;  %2254 = vmatprep.subr.msk.bf16.mxu0 %vm736_vm3, %v663_v5  ;;  %v738_v7 = vsel %vm736_vm3, %v663_v5, 0  ;;  %v2439_v8 = vld [vmem:[%s3291_s9 + $0x8] sm:$0xff]   ;;  %v2444_v13 = vld [vmem:[%s3291_s9 + $0x30] sm:$0xff]   ;;  %s2885_s15 = smov 120   ;;  %vm1318_vm5 = vcmask 7168  }
 0x1f2   : > { %2169 = vmatpush3.bf16.msra.mxu0 %v738_v7  ;;  %2170 = vmatprep.mubr.msk.bf16.mxu0 %vm711_vm4, %v2438_v6  ;;  %v2442_v11 = vld [vmem:[%s3291_s9 + $0x20] sm:$0xff]   ;;  %v2443_v12 = vld [vmem:[%s3291_s9 + $0x28] sm:$0xff]   ;;  %v2445_v14 = vld [vmem:[%s3291_s9 + $0x38] sm:$0xff]   ;;  %s4026_s19 = sld [smem:[#allocation26_spill]] }
 0x1f3   : > { %v845_v15 = vld [vmem:[#allocation2] sm:$0xff]  ;;  %v2069_v17 = vld [vmem:[#allocation16] ss:$0 sm:$0xff] }
 0x1f4   : > { %2202 = vmatprep.mubr.msk.bf16.mxu1 %vm711_vm4, %v845_v15  ;;  %v846_v1 = vld [vmem:[#allocation2 + $0x8] sm:$0xff]  ;;  %v848_v3 = vld [vmem:[#allocation2 + $0x18] sm:$0xff]  ;;  %v849_v4 = vld [vmem:[#allocation2 + $0x20] sm:$0xff] }
 0x1f5   : > { %2171 = vmatmul.mubr.msk.bf16.vlgmr.msra.gmra.mrb[0].mxu0 %vm711_vm4, %v2439_v8  ;;  %v847_v2 = vld [vmem:[#allocation2 + $0x10] sm:$0xff]  ;;  %v850_v5 = vld [vmem:[#allocation2 + $0x28] sm:$0xff]  ;;  %v852_v7 = vld [vmem:[#allocation2 + $0x38] sm:$0xff] }
 0x1f6   : > { %2174 = vmatprep.mubr.msk.bf16.mxu0 %vm711_vm4, %v2440_v9  ;;  %v851_v6 = vld [vmem:[#allocation2 + $0x30] sm:$0xff] }
 0x1f8   : > { %p2094_p12 = scmp.ne.s32.totalorder %s4026_s19, 1 }
 0x1f9   : > { %s1636_s5 = sld [smem:[#allocation6]] (!%p2094_p12) }
 0x1fd   : > { %2175 = vmatmul.mubr.msk.bf16.gmra.mrb[4].mxu0 %vm711_vm4, %v2441_v10 }
 0x1fe   : > { %2178 = vmatprep.mubr.msk.bf16.mxu0 %vm711_vm4, %v2442_v11 }
 0x205   : > { %2179 = vmatmul.mubr.msk.bf16.gmra.mrb[8].mxu0 %vm711_vm4, %v2443_v12 }
 0x206   : > { %2182 = vmatprep.mubr.msk.bf16.mxu0 %vm711_vm4, %v2444_v13 }
 0x20d   : > { %2183 = vmatmul.mubr.msk.bf16.gmra.mrb[12].mxu0 %vm711_vm4, %v2445_v14 }
 0x2c8   : > { %v2172_v16 = vpop.f32.mrb[0].mxu0 }
 0x2c9   : > { %v774_v18 = vpop.f32.mrb[1].mxu0  ;;  %v783_v20 = vadd.f32 %v2172_v16, %v2069_v17 }
 0x2ca   : > { %v2173_v19 = vpop.f32.mrb[2].mxu0  ;;  %v775_v23 = vadd.f32 %v2069_v17, %v774_v18 }
 0x2cb   : > { %v786_v21 = vadd.f32 %v2173_v19, %v2069_v17  ;;  %v777_v22 = vpop.f32.mrb[3].mxu0 }
 0x2cc   : > { %v778_v24 = vadd.f32 %v2069_v17, %v777_v22 }
 0x2cd   : > { %v3419_v25 = vpack.c.bf16 %v786_v21, %v783_v20 }
 0x2ce   : > { %v3421_v26 = vpack.c.bf16 %v778_v24, %v775_v23 }
 0x2cf   : > { %v881_v38 = vsel %vm711_vm4, %v3419_v25, 0 }
 0x2d0   : > { %2255 = vmatprep.subr.msk.bf16.mxu1 %vm711_vm4, %v3421_v26  ;;  %v878_v27 = vsel %vm711_vm4, %v3421_v26, 0  ;;  %v2176_v28 = vpop.f32.mrb[4].mxu0 }
 0x2d1   : > { %2187 = vmatpush3.bf16.xpose.msra.mxu1 %v878_v27  ;;  %v799_v29 = vadd.f32 %v2176_v28, %v2069_v17  ;;  %v790_v30 = vpop.f32.mrb[5].mxu0  ;;  %v3536_v27 = vld [vmem:[#allocation3] sm:$0xff] }
 0x2d2   : > { %2256 = vmatprep.subr.msk.bf16.mxu1 %vm711_vm4, %v3419_v25  ;;  %v791_v31 = vadd.f32 %v2069_v17, %v790_v30  ;;  %v2177_v32 = vpop.f32.mrb[6].mxu0 }
 0x2d3   : > { %v802_v33 = vadd.f32 %v2177_v32, %v2069_v17  ;;  %v793_v34 = vpop.f32.mrb[7].mxu0  ;;  %v3549_v32 = vld [vmem:[#allocation3 + $0x8] sm:$0xff] }
 0x2d4   : > { %v794_v35 = vadd.f32 %v2069_v17, %v793_v34 }
 0x2d5   : > { %v3429_v36 = vpack.c.bf16 %v802_v33, %v799_v29 }
 0x2d6   : > { %v3431_v37 = vpack.c.bf16 %v794_v35, %v791_v31  ;;  %v3544_v31 = vld [vmem:[#allocation3 + $0x18] sm:$0xff] }
 0x2d7   : > { %v887_v60 = vsel %vm711_vm4, %v3429_v36, 0 }
 0x2d8   : > { %v2180_v39 = vpop.f32.mrb[8].mxu0  ;;  %v884_v49 = vsel %vm711_vm4, %v3431_v37, 0 }
 0x2d9   : > { %2189 = vmatpush3.bf16.xpose.msra.mxu1 %v881_v38  ;;  %v815_v40 = vadd.f32 %v2180_v39, %v2069_v17  ;;  %v806_v41 = vpop.f32.mrb[9].mxu0  ;;  %v3569_v39 = vld [vmem:[#allocation3 + $0x38] sm:$0xff] }
 0x2da   : > { %2257 = vmatprep.subr.msk.bf16.mxu1 %vm711_vm4, %v3431_v37  ;;  %v807_v42 = vadd.f32 %v2069_v17, %v806_v41  ;;  %v2181_v43 = vpop.f32.mrb[10].mxu0 }
 0x2db   : > { %v818_v44 = vadd.f32 %v2181_v43, %v2069_v17  ;;  %v809_v45 = vpop.f32.mrb[11].mxu0 }
 0x2dc   : > { %v810_v46 = vadd.f32 %v2069_v17, %v809_v45  ;;  %v3582_v45 = vld [vmem:[#allocation3 + $0x28] sm:$0xff] }
 0x2dd   : > { %v3437_v47 = vpack.c.bf16 %v818_v44, %v815_v40  ;;  %v3577_v44 = vld [vmem:[#allocation3 + $0x30] sm:$0xff] }
 0x2de   : > { %v3439_v48 = vpack.c.bf16 %v810_v46, %v807_v42 }
 0x2df   : > { %v893_v62 = vsel %vm711_vm4, %v3437_v47, 0 }
 0x2e0   : > { %v2184_v50 = vpop.f32.mrb[12].mxu0  ;;  %v890_v61 = vsel %vm711_vm4, %v3439_v48, 0 }
 0x2e1   : > { %2191 = vmatpush3.bf16.xpose.msra.mxu1 %v884_v49  ;;  %v831_v51 = vadd.f32 %v2184_v50, %v2069_v17  ;;  %v822_v52 = vpop.f32.mrb[13].mxu0 }
 0x2e2   : > { %2258 = vmatprep.subr.msk.bf16.mxu1 %vm711_vm4, %v3429_v36  ;;  %v823_v53 = vadd.f32 %v2069_v17, %v822_v52  ;;  %v2185_v54 = vpop.f32.mrb[14].mxu0  ;;  %v3600_v52 = vld [vmem:[#allocation3 + $0x58] sm:$0xff] }
 0x2e3   : > { %v834_v55 = vadd.f32 %v2185_v54, %v2069_v17  ;;  %v825_v56 = vpop.f32.mrb[15].mxu0 }
 0x2e4   : > { %v826_v57 = vadd.f32 %v2069_v17, %v825_v56  ;;  %v2884_v17 = vmov 0  }
 0x2e5   : > { %v3445_v58 = vpack.c.bf16 %v834_v55, %v831_v51  ;;  %2436 = vset.pattern.permute.xlu0 %v2884_v17  ;;  %2437 = vset.pattern.permute.xlu1 %v2884_v17  ;;  %v3595_v51 = vld [vmem:[#allocation3 + $0x40] sm:$0xff]  ;;  %v3637_v17 = vld [vmem:[#allocation3 + $0x70] sm:$0xff] }
 0x2e6   : > { %v3447_v59 = vpack.c.bf16 %v826_v57, %v823_v53 }
 0x2e7   : > { %v899_v0 = vsel %vm711_vm4, %v3445_v58, 0 }
 0x2e8   : > { %v896_v63 = vsel %vm711_vm4, %v3447_v59, 0 }
 0x2e9   : > { %2193 = vmatpush3.bf16.xpose.msra.mxu1 %v887_v60  ;;  %v3613_v60 = vld [vmem:[#allocation3 + $0x50] sm:$0xff] }
 0x2ea   : > { %2259 = vmatprep.subr.msk.bf16.mxu1 %vm711_vm4, %v3439_v48 }
 0x2f1   : > { %2195 = vmatpush3.bf16.xpose.msra.mxu1 %v890_v61  ;;  %v3618_v61 = vld [vmem:[#allocation3 + $0x48] sm:$0xff] }
 0x2f2   : > { %2260 = vmatprep.subr.msk.bf16.mxu1 %vm711_vm4, %v3437_v47 }
 0x2f9   : > { %2197 = vmatpush3.bf16.xpose.msra.mxu1 %v893_v62 }
 0x2fa   : > { %2261 = vmatprep.subr.msk.bf16.mxu1 %vm711_vm4, %v3447_v59 }
 0x301   : > { %2199 = vmatpush3.bf16.xpose.msra.mxu1 %v896_v63 }
 0x302   : > { %2262 = vmatprep.subr.msk.bf16.mxu1 %vm711_vm4, %v3445_v58 }
 0x309   : > { %2201 = vmatpush3.bf16.xpose.msra.mxu1 %v899_v0 }
 0x310   : > { %2203 = vmatmul.mubr.msk.bf16.vlgmr.msra.gmra.mrb[0].mxu1 %vm711_vm4, %v846_v1 }
 0x311   : > { %2206 = vmatprep.mubr.msk.bf16.mxu1 %vm711_vm4, %v847_v2 }
 0x318   : > { %2207 = vmatmul.mubr.msk.bf16.gmra.mrb[4].mxu1 %vm711_vm4, %v848_v3  ;;  %v1010_v3 = vld [vmem:[#allocation3 + $0x60] sm:$0xff] }
 0x319   : > { %2210 = vmatprep.mubr.msk.bf16.mxu1 %vm711_vm4, %v849_v4 }
 0x320   : > { %2211 = vmatmul.mubr.msk.bf16.gmra.mrb[8].mxu1 %vm711_vm4, %v850_v5 }
 0x321   : > { %2214 = vmatprep.mubr.msk.bf16.mxu1 %vm711_vm4, %v851_v6 }
 0x328   : > { %2215 = vmatmul.mubr.msk.bf16.gmra.mrb[12].mxu1 %vm711_vm4, %v852_v7 }
 0x3e3   : > { %v3474_v8 = vpop.f32.mrb[0].mxu1 }
 0x3e4   : > { %1018 = vmax.xlane.f32.xlu1 %v3474_v8  ;;  %v3477_v9 = vpop.f32.mrb[1].mxu1 }
 0x3e5   : > { %1014 = vmax.xlane.f32.xlu0 %v3477_v9  ;;  %v3480_v10 = vpop.f32.mrb[2].mxu1 }
 0x3e6   : > { %v3482_v11 = vpop.f32.mrb[3].mxu1 }
 0x3e8   : > { %1020 = vmax.xlane.f32.xlu1 %v3480_v10 }
 0x3e9   : > { %1016 = vmax.xlane.f32.xlu0 %v3482_v11 }
 0x3eb   : > { %v3486_v12 = vpop.f32.mrb[4].mxu1 }
 0x3ec   : > { %v3488_v13 = vpop.f32.mrb[5].mxu1 }
 0x3ed   : > { %1022 = vmax.xlane.f32.xlu0 %v3488_v13  ;;  %v3491_v14 = vpop.f32.mrb[6].mxu1 }
 0x3ee   : > { %1028 = vmax.xlane.f32.xlu1 %v3491_v14  ;;  %v3494_v15 = vpop.f32.mrb[7].mxu1 }
 0x3f1   : > { %1026 = vmax.xlane.f32.xlu0 %v3486_v12 }
 0x3f2   : > { %1024 = vmax.xlane.f32.xlu1 %v3494_v15 }
 0x3f3   : > { %v3498_v16 = vpop.f32.mrb[8].mxu1 }
 0x3f4   : > { %v3500_v18 = vpop.f32.mrb[9].mxu1 }
 0x3f5   : > { %1030 = vmax.xlane.f32.xlu0 %v3500_v18  ;;  %v3503_v19 = vpop.f32.mrb[10].mxu1 }
 0x3f6   : > { %1036 = vmax.xlane.f32.xlu1 %v3503_v19  ;;  %v3506_v20 = vpop.f32.mrb[11].mxu1 }
 0x3f9   : > { %1034 = vmax.xlane.f32.xlu0 %v3498_v16 }
 0x3fa   : > { %1032 = vmax.xlane.f32.xlu1 %v3506_v20 }
 0x3fb   : > { %v3510_v21 = vpop.f32.mrb[12].mxu1 }
 0x3fc   : > { %v3512_v22 = vpop.f32.mrb[13].mxu1 }
 0x3fd   : > { %1038 = vmax.xlane.f32.xlu0 %v3512_v22  ;;  %v3515_v23 = vpop.f32.mrb[14].mxu1 }
 0x3fe   : > { %v3517_v24 = vpop.f32.mrb[15].mxu1 }
 0x401   : > { %1042 = vmax.xlane.f32.xlu0 %v3510_v21 }
 0x40b   : > { %1465 = vrot.lane.b32.xlu1 %v3419_v25, %s2885_s15  ;;  %v3534_v25 = vld [vmem:[#allocation3 + $0x10] sm:$0xff] }
 0x40f   : > { %1467 = vrot.lane.b32.xlu1 %v3431_v37, %s2885_s15  ;;  %v3562_v37 = vld [vmem:[#allocation3 + $0x20] sm:$0xff] }
 0x417   : > { %1463 = vrot.lane.b32.xlu0 %v3421_v26, %s2885_s15 }
 0x41b   : > { %1469 = vrot.lane.b32.xlu0 %v3429_v36, %s2885_s15 }
 0x41f   : > { %1473 = vrot.lane.b32.xlu0 %v3437_v47, %s2885_s15 }
 0x433   : > { %1044 = vmax.xlane.f32.xlu1 %v3515_v23 }
 0x437   : > { %1040 = vmax.xlane.f32.xlu1 %v3517_v24 }
 0x448   : > { %1471 = vrot.lane.b32.xlu1 %v3439_v48, %s2885_s15 }
 0x471   : > { %v1019_v28 = vpop.xlane.xlu1 %1018 }
 0x472   : > { %v3539_v26 = vmax.f32 %v3534_v25, %v1019_v28  ;;  %v1015_v29 = vpop.xlane.xlu0 %1014 }
 0x473   : > { %v3542_v30 = vmax.f32 %v3536_v27, %v1015_v29 }
 0x474   : > { %1618 = vst.msk [vmem:[#allocation3 + $0x10] sm:$0xff] %vm1318_vm5, %v3539_v26  ;;  %1122 = vperm.xlu0 %2436, %v3539_v26   ;;  %v1064_v28 = vsub.f32 %v3534_v25, %v3539_v26 }
 0x475   : > { %1616 = vst.msk [vmem:[#allocation3] sm:$0xff] %vm1318_vm5, %v3542_v30  ;;  %v1021_v33 = vpop.xlane.xlu1 %1020  ;;  %1112 = vperm.xlu1 %2437, %v3542_v30   ;;  %v1062_v4 = vsub.f32 %v3536_v27, %v3542_v30 }
 0x476   : > { %v3555_v34 = vmax.f32 %v3544_v31, %v1021_v33  ;;  %v1017_v35 = vpop.xlane.xlu0 %1016 }
 0x477   : > { %v3558_v36 = vmax.f32 %v3549_v32, %v1017_v35  ;;  %v1078_v27 = vmul.f32 1.442695, %v1062_v4  ;;  %v1082_v35 = vmul.f32 1.442695, %v1064_v28 }
 0x478   : > { %1619 = vst.msk [vmem:[#allocation3 + $0x18] sm:$0xff] %vm1318_vm5, %v3555_v34  ;;  %v1065_v25 = vsub.f32 %v3544_v31, %v3555_v34 }
 0x479   : > { %v1063_v38 = vsub.f32 %v3549_v32, %v3558_v36  ;;  %1617 = vst.msk [vmem:[#allocation3 + $0x8] sm:$0xff] %vm1318_vm5, %v3558_v36  ;;  %1127 = vperm.xlu1 %2437, %v3555_v34   ;;  %2446 = vpow2.f32 %v1078_v27 }
 0x47a   : > { %v1023_v40 = vpop.xlane.xlu0 %1022  ;;  %2448 = vpow2.f32 %v1082_v35 }
 0x47b   : > { %v3572_v41 = vmax.f32 %v3562_v37, %v1023_v40  ;;  %v1029_v42 = vpop.xlane.xlu1 %1028  ;;  %v1084_v40 = vmul.f32 1.442695, %v1065_v25 }
 0x47c   : > { %v3575_v43 = vmax.f32 %v3569_v39, %v1029_v42 }
 0x47d   : > { %1620 = vst.msk [vmem:[#allocation3 + $0x20] sm:$0xff] %vm1318_vm5, %v3572_v41  ;;  %1117 = vperm.xlu1 %2437, %v3558_v36   ;;  %v1066_v42 = vsub.f32 %v3562_v37, %v3572_v41  ;;  %2450 = vpow2.f32 %v1084_v40 }
 0x47e   : > { %v1069_v46 = vsub.f32 %v3569_v39, %v3575_v43  ;;  %1623 = vst.msk [vmem:[#allocation3 + $0x38] sm:$0xff] %vm1318_vm5, %v3575_v43  ;;  %v1027_v47 = vpop.xlane.xlu0 %1026  ;;  %1147 = vperm.xlu0 %2436, %v3575_v43  }
 0x47f   : > { %v3590_v48 = vmax.f32 %v3577_v44, %v1027_v47  ;;  %v1025_v49 = vpop.xlane.xlu1 %1024 }
 0x480   : > { %v3593_v50 = vmax.f32 %v3582_v45, %v1025_v49  ;;  %v1092_v32 = vmul.f32 1.442695, %v1069_v46 }
 0x481   : > { %1622 = vst.msk [vmem:[#allocation3 + $0x30] sm:$0xff] %vm1318_vm5, %v3590_v48  ;;  %1142 = vperm.xlu1 %2437, %v3590_v48   ;;  %v1068_v31 = vsub.f32 %v3577_v44, %v3590_v48 }
 0x482   : > { %v1067_v53 = vsub.f32 %v3582_v45, %v3593_v50  ;;  %1621 = vst.msk [vmem:[#allocation3 + $0x28] sm:$0xff] %vm1318_vm5, %v3593_v50  ;;  %v1031_v54 = vpop.xlane.xlu0 %1030  ;;  %1137 = vperm.xlu0 %2436, %v3593_v50  }
 0x483   : > { %v3608_v55 = vmax.f32 %v3595_v51, %v1031_v54  ;;  %v1037_v56 = vpop.xlane.xlu1 %1036  ;;  %v3661_v34 = vpop.eup %2446  ;;  %v1090_v54 = vmul.f32 1.442695, %v1068_v31 }
 0x484   : > { %v3611_v57 = vmax.f32 %v3600_v52, %v1037_v56  ;;  %v1088_v25 = vmul.f32 1.442695, %v1067_v53 }
 0x485   : > { %1624 = vst.msk [vmem:[#allocation3 + $0x40] sm:$0xff] %vm1318_vm5, %v3608_v55  ;;  %1132 = vperm.xlu1 %2437, %v3572_v41   ;;  %v3665_v41 = vpop.eup %2448  ;;  %v1070_v44 = vsub.f32 %v3595_v51, %v3608_v55 }
 0x486   : > { %v1073_v62 = vsub.f32 %v3600_v52, %v3611_v57  ;;  %1627 = vst.msk [vmem:[#allocation3 + $0x58] sm:$0xff] %vm1318_vm5, %v3611_v57  ;;  %v1035_v63 = vpop.xlane.xlu0 %1034  ;;  %1167 = vperm.xlu0 %2436, %v3611_v57  }
 0x487   : > { %v1056_v0 = vmax.f32 %v3613_v60, %v1035_v63  ;;  %v1033_v1 = vpop.xlane.xlu1 %1032  ;;  %v3670_v56 = vpop.eup %2450 }
 0x488   : > { %v3627_v2 = vmax.f32 %v3618_v61, %v1033_v1  ;;  %v1094_v1 = vmul.f32 1.442695, %v1070_v44  ;;  %v1100_v45 = vmul.f32 1.442695, %v1073_v62 }
 0x489   : > { %1626 = vst.msk [vmem:[#allocation3 + $0x50] sm:$0xff] %vm1318_vm5, %v1056_v0  ;;  %1162 = vperm.xlu1 %2437, %v1056_v0   ;;  %v1072_v37 = vsub.f32 %v3613_v60, %v1056_v0 }
 0x48a   : > { %v1071_v5 = vsub.f32 %v3618_v61, %v3627_v2  ;;  %1625 = vst.msk [vmem:[#allocation3 + $0x48] sm:$0xff] %vm1318_vm5, %v3627_v2  ;;  %1157 = vperm.xlu0 %2436, %v3627_v2   ;;  %v1039_v6 = vpop.xlane.xlu0 %1038 }
 0x48b   : > { %v1058_v7 = vmax.f32 %v1010_v3, %v1039_v6  ;;  %v1466_v26 = vpop.permute.xlu1 %1465  ;;  %v1098_v48 = vmul.f32 1.442695, %v1072_v37  ;;  %v3688_v6 = vld [vmem:[#allocation3 + $0x78] sm:$0xff] }
 0x48c   : > { %v1096_v39 = vmul.f32 1.442695, %v1071_v5 }
 0x48d   : > { %1628 = vst.msk [vmem:[#allocation3 + $0x60] sm:$0xff] %vm1318_vm5, %v1058_v7  ;;  %1152 = vperm.xlu1 %2437, %v3608_v55   ;;  %v1074_v63 = vsub.f32 %v1010_v3, %v1058_v7 }
 0x48e   : > { %1477 = vrot.lane.b32.xlu0 %v3445_v58, %s2885_s15  ;;  %v1043_v29 = vpop.xlane.xlu0 %1042 }
 0x48f   : > { %v3646_v30 = vmax.f32 %v3637_v17, %v1043_v29  ;;  %v1468_v47 = vpop.permute.xlu1 %1467  ;;  %v1102_v60 = vmul.f32 1.442695, %v1074_v63  ;;  %v1011_v29 = vld [vmem:[#allocation3 + $0x68] sm:$0xff] }
 0x491   : > { %v1076_v33 = vsub.f32 %v3637_v17, %v3646_v30  ;;  %1630 = vst.msk [vmem:[#allocation3 + $0x70] sm:$0xff] %vm1318_vm5, %v3646_v30  ;;  %1475 = vrot.lane.b32.xlu1 %v3447_v59, %s2885_s15  ;;  %v1086_v59 = vmul.f32 1.442695, %v1066_v42 }
 0x492   : > { %v1464_v58 = vpop.permute.xlu0 %1463 }
 0x493   : > { %2218 = vmatprep.subr.bf16.mxu0 %v1464_v58  ;;  %2452 = vpow2.f32 %v1086_v59 }
 0x494   : > { %2219 = vmatpush3.bf16.msra.mxu0 %v1464_v58  ;;  %2454 = vpow2.f32 %v1090_v54 }
 0x495   : > { %2220 = vmatprep.subr.bf16.mxu0 %v1466_v26  ;;  %1172 = vperm.xlu1 %2437, %v1058_v7   ;;  %2456 = vpow2.f32 %v1098_v48  ;;  %v1080_v7 = vmul.f32 1.442695, %v1063_v38 }
 0x496   : > { %v1470_v49 = vpop.permute.xlu0 %1469  ;;  %2458 = vpow2.f32 %v1094_v1 }
 0x497   : > { %2460 = vpow2.f32 %v1102_v60 }
 0x498   : > { %2221 = vmatpush3.bf16.msra.mxu0 %v1466_v26  ;;  %2462 = vpow2.f32 %v1080_v7 }
 0x499   : > { %2222 = vmatprep.subr.bf16.mxu0 %v1468_v47  ;;  %1182 = vperm.xlu1 %2437, %v3646_v30   ;;  %2464 = vpow2.f32 %v1088_v25 }
 0x49a   : > { %v1474_v38 = vpop.permute.xlu0 %1473  ;;  %2466 = vpow2.f32 %v1092_v32 }
 0x49b   : > { %2468 = vpow2.f32 %v1100_v45 }
 0x49c   : > { %2223 = vmatpush3.bf16.msra.mxu0 %v1468_v47  ;;  %2470 = vpow2.f32 %v1096_v39 }
 0x49d   : > { %2224 = vmatprep.subr.bf16.mxu0 %v1470_v49  ;;  %1361 = vperm.xlu1 %2437, %v3661_v34   ;;  %v3673_v4 = vpop.eup %2452 }
 0x49e   : > { %v3676_v0 = vpop.eup %2454 }
 0x49f   : > { %v3679_v51 = vpop.eup %2456 }
 0x4a0   : > { %2225 = vmatpush3.bf16.msra.mxu0 %v1470_v49  ;;  %v3682_v55 = vpop.eup %2458 }
 0x4a1   : > { %1371 = vperm.xlu1 %2437, %v3665_v41   ;;  %v3685_v3 = vpop.eup %2460 }
 0x4a2   : > { %v3711_v50 = vpop.eup %2462 }
 0x4a3   : > { %v3717_v46 = vpop.eup %2464 }
 0x4a4   : > { %v3720_v40 = vpop.eup %2466 }
 0x4a5   : > { %1376 = vperm.xlu1 %2437, %v3670_v56   ;;  %v3723_v52 = vpop.eup %2468 }
 0x4a6   : > { %v3726_v57 = vpop.eup %2470 }
 0x4a9   : > { %1381 = vperm.xlu1 %2437, %v3673_v4  }
 0x4ad   : > { %1391 = vperm.xlu1 %2437, %v3676_v0  }
 0x4b1   : > { %1411 = vperm.xlu1 %2437, %v3679_v51  }
 0x4b5   : > { %1401 = vperm.xlu1 %2437, %v3682_v55  }
 0x4b9   : > { %1421 = vperm.xlu1 %2437, %v3685_v3  }
 0x4c0   : > { %v1045_v28 = vpop.xlane.xlu1 %1044 }
 0x4c1   : > { %v3694_v27 = vmax.f32 %v3688_v6, %v1045_v28 }
 0x4c3   : > { %v1077_v35 = vsub.f32 %v3688_v6, %v3694_v27  ;;  %1631 = vst.msk [vmem:[#allocation3 + $0x78] sm:$0xff] %vm1318_vm5, %v3694_v27 }
 0x4c4   : > { %v1041_v26 = vpop.xlane.xlu1 %1040 }
 0x4c5   : > { %v1059_v58 = vmax.f32 %v1011_v29, %v1041_v26 }
 0x4c7   : > { %1629 = vst.msk [vmem:[#allocation3 + $0x68] sm:$0xff] %vm1318_vm5, %v1059_v58  ;;  %1177 = vperm.xlu0 %2436, %v1059_v58   ;;  %v1075_v43 = vsub.f32 %v1011_v29, %v1059_v58 }
 0x4c8   : > { %v1472_v36 = vpop.permute.xlu1 %1471 }
 0x4c9   : > { %2226 = vmatprep.subr.bf16.mxu0 %v1472_v36  ;;  %v1104_v53 = vmul.f32 1.442695, %v1075_v43 }
 0x4ca   : > { %2227 = vmatpush3.bf16.msra.mxu0 %v1472_v36 }
 0x4cb   : > { %1187 = vperm.xlu0 %2436, %v3694_v27   ;;  %2228 = vmatprep.subr.bf16.mxu0 %v1474_v38  ;;  %2472 = vpow2.f32 %v1104_v53 }
 0x4ce   : > { %2229 = vmatpush3.bf16.msra.mxu0 %v1474_v38 }
 0x4cf   : > { %1366 = vperm.xlu0 %2436, %v3711_v50  }
 0x4d3   : > { %1386 = vperm.xlu0 %2436, %v3717_v46  }
 0x4d5   : > { %v3729_v61 = vpop.eup %2472 }
 0x4d7   : > { %1396 = vperm.xlu0 %2436, %v3720_v40  }
 0x4db   : > { %1416 = vperm.xlu0 %2436, %v3723_v52  }
 0x4df   : > { %1406 = vperm.xlu0 %2436, %v3726_v57  }
 0x4e3   : > { %1426 = vperm.xlu0 %2436, %v3729_v61  }
 0x4f3   : > { %v1123_v62 = vpop.permute.xlu0 %1122 }
 0x4f4   : > { %v1192_v2 = vsub.f32 %v3474_v8, %v1123_v62  ;;  %v1113_v5 = vpop.permute.xlu1 %1112 }
 0x4f5   : > { %v1190_v42 = vsub.f32 %v3477_v9, %v1113_v5 }
 0x4f6   : > { %v1210_v47 = vmul.f32 1.442695, %v1192_v2 }
 0x4f7   : > { %v1206_v59 = vmul.f32 1.442695, %v1190_v42 }
 0x4f8   : > { %2474 = vpow2.f32 %v1210_v47  ;;  %v1128_v31 = vpop.permute.xlu1 %1127 }
 0x4f9   : > { %2476 = vpow2.f32 %v1206_v59  ;;  %v1193_v49 = vsub.f32 %v3480_v10, %v1128_v31 }
 0x4fb   : > { %v1212_v54 = vmul.f32 1.442695, %v1193_v49 }
 0x4fc   : > { %v1118_v37 = vpop.permute.xlu1 %1117 }
 0x4fd   : > { %2478 = vpow2.f32 %v1212_v54  ;;  %v1191_v44 = vsub.f32 %v3482_v11, %v1118_v37  ;;  %v1148_v48 = vpop.permute.xlu0 %1147 }
 0x4fe   : > { %v1197_v63 = vsub.f32 %v3491_v14, %v1148_v48 }
 0x4ff   : > { %v1208_v1 = vmul.f32 1.442695, %v1191_v44 }
 0x500   : > { %v1220_v8 = vmul.f32 1.442695, %v1197_v63  ;;  %v1143_v60 = vpop.permute.xlu1 %1142 }
 0x501   : > { %2480 = vpow2.f32 %v1208_v1  ;;  %v1196_v9 = vsub.f32 %v3486_v12, %v1143_v60  ;;  %v1138_v7 = vpop.permute.xlu0 %1137 }
 0x502   : > { %v2475_v28 = vpop.eup %2474  ;;  %v1195_v29 = vsub.f32 %v3494_v15, %v1138_v7  ;;  %2482 = vpow2.f32 %v1220_v8 }
 0x503   : > { %v2477_v25 = vpop.eup %2476  ;;  %v1218_v10 = vmul.f32 1.442695, %v1196_v9  ;;  %1274 = vadd.xlane.f32.xlu0 %v2475_v28 }
 0x504   : > { %v1216_v26 = vmul.f32 1.442695, %v1195_v29  ;;  %1270 = vadd.xlane.f32.xlu1 %v2477_v25  ;;  %v1133_v11 = vpop.permute.xlu1 %1132 }
 0x505   : > { %2484 = vpow2.f32 %v1218_v10  ;;  %v1194_v14 = vsub.f32 %v3488_v13, %v1133_v11  ;;  %v1168_v58 = vpop.permute.xlu0 %1167 }
 0x506   : > { %v1201_v32 = vsub.f32 %v3503_v19, %v1168_v58  ;;  %2486 = vpow2.f32 %v1216_v26 }
 0x507   : > { %v2479_v36 = vpop.eup %2478  ;;  %v1214_v38 = vmul.f32 1.442695, %v1194_v14 }
 0x508   : > { %v1228_v12 = vmul.f32 1.442695, %v1201_v32  ;;  %1276 = vadd.xlane.f32.xlu0 %v2479_v36  ;;  %v1163_v45 = vpop.permute.xlu1 %1162  ;;  %v1336_v15 = vpack.c.bf16 %v2479_v36, %v2475_v28 }
 0x509   : > { %2488 = vpow2.f32 %v1214_v38  ;;  %v1200_v39 = vsub.f32 %v3498_v16, %v1163_v45  ;;  %v1158_v43 = vpop.permute.xlu0 %1157 }
 0x50a   : > { %v1199_v53 = vsub.f32 %v3506_v20, %v1158_v43  ;;  %2490 = vpow2.f32 %v1228_v12 }
 0x50b   : > { %v2481_v62 = vpop.eup %2480  ;;  %v1226_v2 = vmul.f32 1.442695, %v1200_v39 }
 0x50c   : > { %v1224_v13 = vmul.f32 1.442695, %v1199_v53  ;;  %1272 = vadd.xlane.f32.xlu0 %v2481_v62  ;;  %v1153_v5 = vpop.permute.xlu1 %1152  ;;  %v1335_v19 = vpack.c.bf16 %v2481_v62, %v2477_v25  ;;  %v2483_v47 = vpop.eup %2482 }
 0x50d   : > { %2492 = vpow2.f32 %v1226_v2  ;;  %v1198_v42 = vsub.f32 %v3500_v18, %v1153_v5  ;;  %v1478_v54 = vpop.permute.xlu0 %1477 }
 0x50e   : > { %2234 = vmatprep.mubr.bf16.mxu0 %v1335_v19  ;;  %2494 = vpow2.f32 %v1224_v13 }
 0x50f   : > { %v2485_v59 = vpop.eup %2484  ;;  %v1222_v31 = vmul.f32 1.442695, %v1198_v42 }
 0x510   : > { %1284 = vadd.xlane.f32.xlu0 %v2483_v47  ;;  %1282 = vadd.xlane.f32.xlu1 %v2485_v59  ;;  %v1476_v16 = vpop.permute.xlu1 %1475  ;;  %v1338_v49 = vpack.c.bf16 %v2483_v47, %v2485_v59  ;;  %v2487_v20 = vpop.eup %2486  ;;  %v1240_v47 = vld [vmem:[#allocation4 + $0x10] sm:$0xff] }
 0x511   : > { %2496 = vpow2.f32 %v1222_v31  ;;  %2230 = vmatprep.subr.bf16.mxu0 %v1476_v16  ;;  %v1238_v31 = vld [vmem:[#allocation4] sm:$0xff] }
 0x512   : > { %2231 = vmatpush3.bf16.msra.mxu0 %v1476_v16  ;;  %v1256_v16 = vmul.f32 %v3665_v41, %v1240_v47 }
 0x513   : > { %v2489_v37 = vpop.eup %2488  ;;  %2232 = vmatprep.subr.bf16.mxu0 %v1478_v54 }
 0x514   : > { %1280 = vadd.xlane.f32.xlu0 %v2487_v20  ;;  %1278 = vadd.xlane.f32.xlu1 %v2489_v37  ;;  %v1173_v44 = vpop.permute.xlu1 %1172  ;;  %v1337_v18 = vpack.c.bf16 %v2487_v20, %v2489_v37  ;;  %v2491_v48 = vpop.eup %2490  ;;  %v1254_v20 = vmul.f32 %v3661_v34, %v1238_v31  ;;  %v1244_v34 = vld [vmem:[#allocation4 + $0x30] sm:$0xff] }
 0x515   : > { %v1202_v60 = vsub.f32 %v3512_v22, %v1173_v44  ;;  %v1241_v44 = vld [vmem:[#allocation4 + $0x18] sm:$0xff] }
 0x516   : > { %2233 = vmatpush3.bf16.msra.mxu0 %v1478_v54 }
 0x517   : > { %v2493_v63 = vpop.eup %2492  ;;  %v1230_v10 = vmul.f32 1.442695, %v1202_v60 }
 0x518   : > { %1292 = vadd.xlane.f32.xlu0 %v2491_v48  ;;  %1290 = vadd.xlane.f32.xlu1 %v2493_v63  ;;  %v1183_v1 = vpop.permute.xlu1 %1182  ;;  %v1340_v8 = vpack.c.bf16 %v2491_v48, %v2493_v63  ;;  %v2495_v7 = vpop.eup %2494  ;;  %v1257_v48 = vmul.f32 %v3670_v56, %v1241_v44  ;;  %v1243_v56 = vld [vmem:[#allocation4 + $0x28] sm:$0xff]  ;;  %v1250_v44 = vld [vmem:[#allocation4 + $0x60] sm:$0xff] }
 0x519   : > { %v1204_v9 = vsub.f32 %v3510_v21, %v1183_v1  ;;  %2235 = vmatmul.mubr.bf16.vlgmr.msra.gmra.mrb[16].mxu0 %v1336_v15  ;;  %v1106_v21 = vmul.f32 1.442695, %v1076_v33  ;;  %v1239_v1 = vld [vmem:[#allocation4 + $0x8] sm:$0xff] }
 0x51a   : > { %2238 = vmatprep.mubr.bf16.mxu0 %v1337_v18  ;;  %v1255_v41 = vmul.f32 %v3711_v50, %v1239_v1  ;;  %v1259_v50 = vmul.f32 %v3717_v46, %v1243_v56  ;;  %v1246_v46 = vld [vmem:[#allocation4 + $0x40] sm:$0xff] }
 0x51b   : > { %v2497_v28 = vpop.eup %2496  ;;  %v1234_v29 = vmul.f32 1.442695, %v1204_v9  ;;  %v1245_v9 = vld [vmem:[#allocation4 + $0x38] sm:$0xff]  ;;  %v1262_v31 = vmul.f32 %v3682_v55, %v1246_v46 }
 0x51c   : > { %1288 = vadd.xlane.f32.xlu0 %v2495_v7  ;;  %1286 = vadd.xlane.f32.xlu1 %v2497_v28  ;;  %v1339_v25 = vpack.c.bf16 %v2495_v7, %v2497_v28  ;;  %v3754_v33 = vpop.permute.xlu1 %1361  ;;  %v1261_v28 = vmul.f32 %v3720_v40, %v1245_v9  ;;  %v1248_v40 = vld [vmem:[#allocation4 + $0x50] sm:$0xff] }
 0x51d   : > { %2498 = vpow2.f32 %v1234_v29  ;;  %v1260_v29 = vmul.f32 %v3676_v0, %v1244_v34  ;;  %v1343_v34 = vld [vmem:[#allocation5] sm:$0xff] }
 0x51e   : > { %2500 = vpow2.f32 %v1230_v10 }
 0x51f   : > { %2502 = vpow2.f32 %v1106_v21 }
 0x520   : > { %v3759_v39 = vpop.permute.xlu1 %1371 }
 0x521   : > { %2239 = vmatmul.mubr.bf16.gmra.mrb[20].mxu0 %v1338_v49 }
 0x522   : > { %2242 = vmatprep.mubr.bf16.mxu0 %v1339_v25 }
 0x524   : > { %v3763_v43 = vpop.permute.xlu1 %1376 }
 0x527   : > { %v2499_v26 = vpop.eup %2498 }
 0x528   : > { %1298 = vadd.xlane.f32.xlu1 %v2499_v26  ;;  %v2501_v11 = vpop.eup %2500  ;;  %v3770_v2 = vpop.permute.xlu1 %1381 }
 0x529   : > { %2243 = vmatmul.mubr.bf16.gmra.mrb[24].mxu0 %v1340_v8  ;;  %v3749_v22 = vpop.eup %2502 }
 0x52c   : > { %1294 = vadd.xlane.f32.xlu1 %v2501_v11  ;;  %v3774_v5 = vpop.permute.xlu1 %1391 }
 0x530   : > { %v3778_v27 = vpop.permute.xlu1 %1411 }
 0x534   : > { %v3782_v19 = vpop.permute.xlu1 %1401 }
 0x538   : > { %v3786_v59 = vpop.permute.xlu1 %1421 }
 0x53d   : > { %1431 = vperm.xlu1 %2437, %v3749_v22  }
 0x546   : > { %v1178_v14 = vpop.permute.xlu0 %1177 }
 0x547   : > { %v1203_v58 = vsub.f32 %v3517_v24, %v1178_v14  ;;  %v1108_v24 = vmul.f32 1.442695, %v1077_v35 }
 0x549   : > { %v1232_v32 = vmul.f32 1.442695, %v1203_v58 }
 0x54a   : > { %v1188_v36 = vpop.permute.xlu0 %1187 }
 0x54b   : > { %2504 = vpow2.f32 %v1232_v32  ;;  %v1205_v38 = vsub.f32 %v3515_v23, %v1188_v36  ;;  %v1249_v36 = vld [vmem:[#allocation4 + $0x58] sm:$0xff] }
 0x54d   : > { %v1236_v12 = vmul.f32 1.442695, %v1205_v38 }
 0x54e   : > { %v3761_v23 = vpop.permute.xlu0 %1366 }
 0x54f   : > { %2506 = vpow2.f32 %v1236_v12  ;;  %v1265_v12 = vmul.f32 %v3723_v52, %v1249_v36  ;;  %v1348_v36 = vld [vmem:[#allocation5 + $0x28] sm:$0xff] }
 0x550   : > { %2508 = vpow2.f32 %v1108_v24 }
 0x552   : > { %v3767_v62 = vpop.permute.xlu0 %1386 }
 0x555   : > { %v2505_v45 = vpop.eup %2504 }
 0x556   : > { %v1341_v15 = vpack.c.bf16 %v2505_v45, %v2501_v11  ;;  %v3772_v13 = vpop.permute.xlu0 %1396 }
 0x558   : > { %2246 = vmatprep.mubr.bf16.mxu0 %v1341_v15 }
 0x559   : > { %v2507_v17 = vpop.eup %2506 }
 0x55a   : > { %1300 = vadd.xlane.f32.xlu0 %v2507_v17  ;;  %v1342_v30 = vpack.c.bf16 %v2507_v17, %v2499_v26  ;;  %v3765_v53 = vpop.eup %2508  ;;  %v3776_v6 = vpop.permute.xlu0 %1416  ;;  %v1242_v26 = vld [vmem:[#allocation4 + $0x20] sm:$0xff] }
 0x55b   : > { %v1258_v14 = vmul.f32 %v3673_v4, %v1242_v26 }
 0x55c   : > { %2247 = vmatmul.mubr.bf16.gmra.mrb[28].mxu0 %v1342_v30  ;;  %v1247_v30 = vld [vmem:[#allocation4 + $0x48] sm:$0xff] }
 0x55d   : > { %v1263_v47 = vmul.f32 %v3726_v57, %v1247_v30  ;;  %v1266_v57 = vmul.f32 %v3685_v3, %v1250_v44  ;;  %v1344_v3 = vld [vmem:[#allocation5 + $0x8] sm:$0xff] }
 0x55e   : > { %1296 = vadd.xlane.f32.xlu0 %v2505_v45  ;;  %v3780_v35 = vpop.permute.xlu0 %1406  ;;  %v1264_v45 = vmul.f32 %v3679_v51, %v1248_v40  ;;  %v1252_v51 = vld [vmem:[#allocation4 + $0x70] sm:$0xff] }
 0x562   : > { %v3784_v42 = vpop.permute.xlu0 %1426 }
 0x574   : > { %1436 = vperm.xlu0 %2436, %v3765_v53  }
 0x590   : > { %v1275_v49 = vpop.xlane.xlu0 %1274 }
 0x591   : > { %v1304_v54 = vadd.f32 %v1275_v49, %v1256_v16  ;;  %v1271_v37 = vpop.xlane.xlu1 %1270 }
 0x592   : > { %v1302_v18 = vadd.f32 %v1271_v37, %v1254_v20 }
 0x593   : > { %1321 = vst.msk [vmem:[#allocation4 + $0x10] sm:$0xff] %vm1318_vm5, %v1304_v54  ;;  %v1268_v54 = vmul.f32 %v3749_v22, %v1252_v51  ;;  %v1346_v22 = vld [vmem:[#allocation5 + $0x18] sm:$0xff] }
 0x594   : > { %1319 = vst.msk [vmem:[#allocation4] sm:$0xff] %vm1318_vm5, %v1302_v18 }
 0x595   : > { %v1277_v63 = vpop.xlane.xlu0 %1276 }
 0x596   : > { %v1305_v8 = vadd.f32 %v1277_v63, %v1257_v48  ;;  %v1253_v63 = vld [vmem:[#allocation4 + $0x78] sm:$0xff] }
 0x597   : > { %v1269_v1 = vmul.f32 %v3765_v53, %v1253_v63  ;;  %v1442_v53 = vmul.f32 %v3763_v43, %v1346_v22  ;;  %v1350_v43 = vld [vmem:[#allocation5 + $0x38] sm:$0xff]  ;;  %v1356_v63 = vld [vmem:[#allocation5 + $0x68] sm:$0xff] }
 0x598   : > { %1322 = vst.msk [vmem:[#allocation4 + $0x18] sm:$0xff] %vm1318_vm5, %v1305_v8 }
 0x599   : > { %v1273_v60 = vpop.xlane.xlu0 %1272 }
 0x59a   : > { %v1303_v7 = vadd.f32 %v1273_v60, %v1255_v41  ;;  %v1251_v41 = vld [vmem:[#allocation4 + $0x68] sm:$0xff]  ;;  %v1345_v60 = vld [vmem:[#allocation5 + $0x10] sm:$0xff] }
 0x59c   : > { %1320 = vst.msk [vmem:[#allocation4 + $0x8] sm:$0xff] %vm1318_vm5, %v1303_v7  ;;  %v1267_v7 = vmul.f32 %v3729_v61, %v1251_v41 }
 0x59d   : > { %v1285_v25 = vpop.xlane.xlu0 %1284  ;;  %v1283_v10 = vpop.xlane.xlu1 %1282 }
 0x59e   : > { %v1309_v11 = vadd.f32 %v1285_v25, %v1261_v28  ;;  %v1308_v21 = vadd.f32 %v1283_v10, %v1260_v29  ;;  %v1441_v28 = vmul.f32 %v3759_v39, %v1345_v60  ;;  %v1439_v25 = vmul.f32 %v3754_v33, %v1343_v34 }
 0x59f   : > { %v1452_v34 = vmul.f32 %v3784_v42, %v1356_v63  ;;  %v2886_v42 = vmov (!%p2094_p12), 0  }
 0x5a0   : > { %1326 = vst.msk [vmem:[#allocation4 + $0x38] sm:$0xff] %vm1318_vm5, %v1309_v11  ;;  %1325 = vst.msk [vmem:[#allocation4 + $0x30] sm:$0xff] %vm1318_vm5, %v1308_v21  ;;  %v1440_v21 = vmul.f32 %v3761_v23, %v1344_v3  ;;  %2511 = vset.pattern.permute.xlu1 (!%p2094_p12), %v2886_v42  ;;  %2510 = vset.pattern.permute.xlu0 (!%p2094_p12), %v2886_v42 }
 0x5a1   : > { %v1281_v58 = vpop.xlane.xlu0 %1280  ;;  %v1279_v32 = vpop.xlane.xlu1 %1278 }
 0x5a2   : > { %v1307_v38 = vadd.f32 %v1281_v58, %v1259_v50  ;;  %v1306_v0 = vadd.f32 %v1279_v32, %v1258_v14  ;;  %v1349_v58 = vld [vmem:[#allocation5 + $0x30] sm:$0xff]  ;;  %v1347_v32 = vld [vmem:[#allocation5 + $0x20] sm:$0xff] }
 0x5a3   : > { %v1445_v23 = vmul.f32 %v3774_v5, %v1349_v58  ;;  %v1443_v40 = vmul.f32 %v3770_v2, %v1347_v32  ;;  %v1354_v2 = vld [vmem:[#allocation5 + $0x58] sm:$0xff] }
 0x5a4   : > { %1324 = vst.msk [vmem:[#allocation4 + $0x28] sm:$0xff] %vm1318_vm5, %v1307_v38  ;;  %1323 = vst.msk [vmem:[#allocation4 + $0x20] sm:$0xff] %vm1318_vm5, %v1306_v0  ;;  %v1446_v0 = vmul.f32 %v3772_v13, %v1350_v43 }
 0x5a5   : > { %v1293_v15 = vpop.xlane.xlu0 %1292  ;;  %v1291_v17 = vpop.xlane.xlu1 %1290 }
 0x5a6   : > { %v1313_v24 = vadd.f32 %v1293_v15, %v1265_v12  ;;  %v1312_v4 = vadd.f32 %v1291_v17, %v1264_v45  ;;  %v1444_v15 = vmul.f32 %v3767_v62, %v1348_v36 }
 0x5a8   : > { %1330 = vst.msk [vmem:[#allocation4 + $0x58] sm:$0xff] %vm1318_vm5, %v1313_v24  ;;  %1329 = vst.msk [vmem:[#allocation4 + $0x50] sm:$0xff] %vm1318_vm5, %v1312_v4  ;;  %v1353_v4 = vld [vmem:[#allocation5 + $0x50] sm:$0xff] }
 0x5a9   : > { %v1289_v16 = vpop.xlane.xlu0 %1288  ;;  %v1287_v49 = vpop.xlane.xlu1 %1286  ;;  %v1449_v13 = vmul.f32 %v3778_v27, %v1353_v4  ;;  %v1357_v27 = vld [vmem:[#allocation5 + $0x70] sm:$0xff] }
 0x5aa   : > { %v1311_v20 = vadd.f32 %v1289_v16, %v1263_v47  ;;  %v1310_v52 = vadd.f32 %v1287_v49, %v1262_v31  ;;  %v1351_v47 = vld [vmem:[#allocation5 + $0x40] sm:$0xff]  ;;  %v1352_v31 = vld [vmem:[#allocation5 + $0x48] sm:$0xff]  ;;  %v1450_v49 = vmul.f32 %v3776_v6, %v1354_v2 }
 0x5ab   : > { %v1447_v62 = vmul.f32 %v3782_v19, %v1351_v47  ;;  %v1448_v51 = vmul.f32 %v3780_v35, %v1352_v31  ;;  %v1355_v6 = vld [vmem:[#allocation5 + $0x60] sm:$0xff] }
 0x5ac   : > { %1328 = vst.msk [vmem:[#allocation4 + $0x48] sm:$0xff] %vm1318_vm5, %v1311_v20  ;;  %1327 = vst.msk [vmem:[#allocation4 + $0x40] sm:$0xff] %vm1318_vm5, %v1310_v52 }
 0x5af   : > { %v1648_v32 = vld [vmem:[#allocation4 + $0x58] sm:$0xff] (!%p2094_p12) }
 0x5b3   : > { %v1645_v58 = vld [vmem:[#allocation4 + $0x40] sm:$0xff] (!%p2094_p12) }
 0x5b5   : > { %v1299_v37 = vpop.xlane.xlu1 %1298 }
 0x5b6   : > { %v1316_v18 = vadd.f32 %v1299_v37, %v1268_v54 }
 0x5b8   : > { %1333 = vst.msk [vmem:[#allocation4 + $0x70] sm:$0xff] %vm1318_vm5, %v1316_v18 }
 0x5b9   : > { %v1295_v48 = vpop.xlane.xlu1 %1294 }
 0x5ba   : > { %v1314_v55 = vadd.f32 %v1295_v48, %v1266_v57  ;;  %v1358_v48 = vld [vmem:[#allocation5 + $0x78] sm:$0xff] }
 0x5bc   : > { %1331 = vst.msk [vmem:[#allocation4 + $0x60] sm:$0xff] %vm1318_vm5, %v1314_v55 }
 0x5bd   : > { %v1432_v19 = vpop.permute.xlu1 %1431 }
 0x5be   : > { %v1453_v35 = vmul.f32 %v1432_v19, %v1357_v27  ;;  %v1799_v19 = vld [vmem:[%s3283_s24 + $0x8] sm:$0xff] (!%p2094_p12) }
 0x5e7   : > { %v1301_v8 = vpop.xlane.xlu0 %1300 }
 0x5e8   : > { %v1317_v9 = vadd.f32 %v1301_v8, %v1269_v1  ;;  %v1451_v1 = vmul.f32 %v3786_v59, %v1355_v6  ;;  %v1639_v59 = vld [vmem:[#allocation4 + $0x10] sm:$0xff] (!%p2094_p12) }
 0x5e9   : > { %2512 = vrcp.f32 (!%p2094_p12), %v1639_v59 }
 0x5ea   : > { %1334 = vst.msk [vmem:[#allocation4 + $0x78] sm:$0xff] %vm1318_vm5, %v1317_v9 }
 0x5eb   : > { %v1297_v29 = vpop.xlane.xlu0 %1296 }
 0x5ec   : > { %v1315_v10 = vadd.f32 %v1297_v29, %v1267_v7  ;;  %v2236_v56 = vpop.f32.mrb[16].mxu0 }
 0x5ed   : > { %v1586_v26 = vadd.f32 %v2236_v56, %v1441_v28  ;;  %v1521_v11 = vpop.f32.mrb[17].mxu0  ;;  %v1638_v56 = vld [vmem:[#allocation4 + $0x8] sm:$0xff] (!%p2094_p12) }
 0x5ee   : > { %1332 = vst.msk [vmem:[#allocation4 + $0x68] sm:$0xff] %vm1318_vm5, %v1315_v10  ;;  %v1584_v50 = vadd.f32 %v1521_v11, %v1439_v25  ;;  %v2237_v14 = vpop.f32.mrb[18].mxu0  ;;  %v1637_v25 = vld [vmem:[#allocation4] sm:$0xff] (!%p2094_p12)  ;;  %v1640_v10 = vld [vmem:[#allocation4 + $0x18] sm:$0xff] (!%p2094_p12) }
 0x5ef   : > { %1602 = vst.msk [vmem:[#allocation5 + $0x10] sm:$0xff] %vm711_vm4, %v1586_v26  ;;  %v1587_v61 = vadd.f32 %v2237_v14, %v1442_v53  ;;  %v1524_v39 = vpop.f32.mrb[19].mxu0  ;;  %2514 = vrcp.f32 (!%p2094_p12), %v1637_v25  ;;  %v1642_v53 = vld [vmem:[#allocation4 + $0x28] sm:$0xff] (!%p2094_p12)  ;;  %v1641_v26 = vld [vmem:[#allocation4 + $0x20] sm:$0xff] (!%p2094_p12)  ;;  %v1644_v11 = vld [vmem:[#allocation4 + $0x38] sm:$0xff] (!%p2094_p12) }
 0x5f0   : > { %1600 = vst.msk [vmem:[#allocation5] sm:$0xff] %vm711_vm4, %v1584_v50  ;;  %v1585_v33 = vadd.f32 %v1524_v39, %v1440_v21  ;;  %2516 = vrcp.f32 (!%p2094_p12), %v1640_v10  ;;  %v1643_v21 = vld [vmem:[#allocation4 + $0x30] sm:$0xff] (!%p2094_p12)  ;;  %v1802_v25 = vld [vmem:[%s3283_s24 + $0x20] sm:$0xff] (!%p2094_p12) }
 0x5f1   : > { %1603 = vst.msk [vmem:[#allocation5 + $0x18] sm:$0xff] %vm711_vm4, %v1587_v61  ;;  %2518 = vrcp.f32 (!%p2094_p12), %v1638_v56  ;;  %v1646_v61 = vld [vmem:[#allocation4 + $0x48] sm:$0xff] (!%p2094_p12) }
 0x5f2   : > { %1601 = vst.msk [vmem:[#allocation5 + $0x8] sm:$0xff] %vm711_vm4, %v1585_v33  ;;  %2520 = vrcp.f32 (!%p2094_p12), %v1642_v53 }
 0x5f3   : > { %v1437_v55 = vpop.permute.xlu0 %1436  ;;  %2522 = vrcp.f32 (!%p2094_p12), %v1641_v26  ;;  %v2513_v50 = vpop.eup (!%p2094_p12), %2512 }
 0x5f4   : > { %v2240_v38 = vpop.f32.mrb[20].mxu0  ;;  %v1454_v41 = vmul.f32 %v1437_v55, %v1358_v48  ;;  %2524 = vrcp.f32 (!%p2094_p12), %v1644_v11  ;;  %1697 = vperm.xlu1 (!%p2094_p12), %2511, %v2513_v50   ;;  %v1800_v55 = vld [vmem:[%s3283_s24 + $0x10] sm:$0xff] (!%p2094_p12)  ;;  %v1803_v11 = vld [vmem:[%s3283_s24 + $0x28] sm:$0xff] (!%p2094_p12) }
 0x5f5   : > { %v1590_v12 = vadd.f32 %v2240_v38, %v1445_v23  ;;  %v1537_v45 = vpop.f32.mrb[21].mxu0  ;;  %2526 = vrcp.f32 (!%p2094_p12), %v1643_v21  ;;  %v1647_v23 = vld [vmem:[#allocation4 + $0x50] sm:$0xff] (!%p2094_p12) }
 0x5f6   : > { %v1588_v17 = vadd.f32 %v1537_v45, %v1443_v40  ;;  %v2241_v30 = vpop.f32.mrb[22].mxu0  ;;  %2528 = vrcp.f32 (!%p2094_p12), %v1646_v61  ;;  %v1650_v40 = vld [vmem:[#allocation4 + $0x68] sm:$0xff] (!%p2094_p12)  ;;  %v1652_v45 = vld [vmem:[#allocation4 + $0x78] sm:$0xff] (!%p2094_p12)  ;;  %v1671_v31 = vld [vmem:[#allocation5 + $0x10] sm:$0xff] (!%p2094_p12) }
 0x5f7   : > { %1606 = vst.msk [vmem:[#allocation5 + $0x30] sm:$0xff] %vm711_vm4, %v1590_v12  ;;  %v1591_v46 = vadd.f32 %v2241_v30, %v1446_v0  ;;  %v1540_v24 = vpop.f32.mrb[23].mxu0  ;;  %2530 = vrcp.f32 (!%p2094_p12), %v1645_v58  ;;  %v1649_v0 = vld [vmem:[#allocation4 + $0x60] sm:$0xff] (!%p2094_p12)  ;;  %v1804_v58 = vld [vmem:[%s3283_s24 + $0x30] sm:$0xff] (!%p2094_p12) }
 0x5f8   : > { %1604 = vst.msk [vmem:[#allocation5 + $0x20] sm:$0xff] %vm711_vm4, %v1588_v17  ;;  %v1589_v5 = vadd.f32 %v1540_v24, %v1444_v15  ;;  %2532 = vrcp.f32 (!%p2094_p12), %v1648_v32  ;;  %v1651_v17 = vld [vmem:[#allocation4 + $0x70] sm:$0xff] (!%p2094_p12)  ;;  %v1672_v27 = vld [vmem:[#allocation5 + $0x18] sm:$0xff] (!%p2094_p12) }
 0x5f9   : > { %1607 = vst.msk [vmem:[#allocation5 + $0x38] sm:$0xff] %vm711_vm4, %v1591_v46  ;;  %v2515_v14 = vpop.eup (!%p2094_p12), %2514  ;;  %2534 = vrcp.f32 (!%p2094_p12), %v1647_v23 }
 0x5fa   : > { %1605 = vst.msk [vmem:[#allocation5 + $0x28] sm:$0xff] %vm711_vm4, %v1589_v5  ;;  %v2517_v39 = vpop.eup (!%p2094_p12), %2516  ;;  %1687 = vperm.xlu0 (!%p2094_p12), %2510, %v2515_v14   ;;  %2536 = vrcp.f32 (!%p2094_p12), %v1650_v40  ;;  %v1805_v40 = vld [vmem:[%s3283_s24 + $0x38] sm:$0xff] (!%p2094_p12) }
 0x5fb   : > { %v2519_v33 = vpop.eup (!%p2094_p12), %2518  ;;  %1702 = vperm.xlu1 (!%p2094_p12), %2511, %v2517_v39   ;;  %2538 = vrcp.f32 (!%p2094_p12), %v1649_v0 }
 0x5fc   : > { %v2244_v16 = vpop.f32.mrb[24].mxu0  ;;  %v2521_v43 = vpop.eup (!%p2094_p12), %2520  ;;  %2540 = vrcp.f32 (!%p2094_p12), %v1652_v45 }
 0x5fd   : > { %v1594_v20 = vadd.f32 %v2244_v16, %v1449_v13  ;;  %v1553_v52 = vpop.f32.mrb[25].mxu0  ;;  %v2523_v36 = vpop.eup (!%p2094_p12), %2522  ;;  %2542 = vrcp.f32 (!%p2094_p12), %v1651_v17  ;;  %v1669_v13 = vld [vmem:[#allocation5] sm:$0xff] (!%p2094_p12) }
 0x5fe   : > { %v1592_v54 = vadd.f32 %v1553_v52, %v1447_v62  ;;  %v2245_v37 = vpop.f32.mrb[26].mxu0  ;;  %1692 = vperm.xlu0 (!%p2094_p12), %2510, %v2519_v33   ;;  %v2525_v38 = vpop.eup (!%p2094_p12), %2524  ;;  %v3851_v62 = vstv (!%p2094_p12), %s1636_s5  ;;  %v1670_v52 = vld [vmem:[#allocation5 + $0x8] sm:$0xff] (!%p2094_p12)  ;;  %v1675_v10 = vld [vmem:[#allocation5 + $0x30] sm:$0xff] (!%p2094_p12)  ;;  %v1806_v17 = vld [vmem:[%s3283_s24 + $0x40] sm:$0xff] (!%p2094_p12) }
 0x5ff   : > { %1610 = vst.msk [vmem:[#allocation5 + $0x50] sm:$0xff] %vm711_vm4, %v1594_v20  ;;  %v1595_v44 = vadd.f32 %v2245_v37, %v1450_v49  ;;  %v1556_v18 = vpop.f32.mrb[27].mxu0  ;;  %1712 = vperm.xlu1 (!%p2094_p12), %2511, %v2521_v43   ;;  %v2527_v12 = vpop.eup (!%p2094_p12), %2526 }
 0x600   : > { %1608 = vst.msk [vmem:[#allocation5 + $0x40] sm:$0xff] %vm711_vm4, %v1592_v54  ;;  %v1593_v57 = vadd.f32 %v1556_v18, %v1448_v51  ;;  %v2529_v15 = vpop.eup (!%p2094_p12), %2528  ;;  %v1798_v51 = vld [vmem:[%s3283_s24] sm:$0xff] (!%p2094_p12)  ;;  %v1676_v21 = vld [vmem:[#allocation5 + $0x38] sm:$0xff] (!%p2094_p12) }
 0x601   : > { %1611 = vst.msk [vmem:[#allocation5 + $0x58] sm:$0xff] %vm711_vm4, %v1595_v44  ;;  %v2531_v30 = vpop.eup (!%p2094_p12), %2530 }
 0x602   : > { %1609 = vst.msk [vmem:[#allocation5 + $0x48] sm:$0xff] %vm711_vm4, %v1593_v57  ;;  %1707 = vperm.xlu0 (!%p2094_p12), %2510, %v2523_v36   ;;  %v2533_v46 = vpop.eup (!%p2094_p12), %2532 }
 0x603   : > { %1722 = vperm.xlu1 (!%p2094_p12), %2511, %v2525_v38   ;;  %v2535_v24 = vpop.eup (!%p2094_p12), %2534 }
 0x604   : > { %v2537_v4 = vpop.eup (!%p2094_p12), %2536 }
 0x605   : > { %v2539_v5 = vpop.eup (!%p2094_p12), %2538 }
 0x606   : > { %1717 = vperm.xlu0 (!%p2094_p12), %2510, %v2527_v12   ;;  %v2541_v47 = vpop.eup (!%p2094_p12), %2540 }
 0x607   : > { %1732 = vperm.xlu1 (!%p2094_p12), %2511, %v2529_v15   ;;  %v2543_v2 = vpop.eup (!%p2094_p12), %2542  ;;  %v1677_v33 = vld [vmem:[#allocation5 + $0x40] sm:$0xff] (!%p2094_p12) }
 0x609   : > { %v1678_v38 = vld [vmem:[#allocation5 + $0x48] sm:$0xff] (!%p2094_p12) }
 0x60a   : > { %1727 = vperm.xlu0 (!%p2094_p12), %2510, %v2531_v30   ;;  %v1679_v30 = vld [vmem:[#allocation5 + $0x50] sm:$0xff] (!%p2094_p12) }
 0x60b   : > { %1742 = vperm.xlu1 (!%p2094_p12), %2511, %v2533_v46  }
 0x60e   : > { %1737 = vperm.xlu0 (!%p2094_p12), %2510, %v2535_v24  }
 0x60f   : > { %1752 = vperm.xlu1 (!%p2094_p12), %2511, %v2537_v4  }
 0x612   : > { %1747 = vperm.xlu0 (!%p2094_p12), %2510, %v2539_v5  }
 0x613   : > { %1762 = vperm.xlu1 (!%p2094_p12), %2511, %v2541_v47   ;;  %v1807_v47 = vld [vmem:[%s3283_s24 + $0x48] sm:$0xff] (!%p2094_p12) }
 0x616   : > { %1757 = vperm.xlu0 (!%p2094_p12), %2510, %v2543_v2   ;;  %v1680_v2 = vld [vmem:[#allocation5 + $0x58] sm:$0xff] (!%p2094_p12) }
 0x62f   : > { %v2248_v8 = vpop.f32.mrb[28].mxu0  ;;  %1635 = sbr.rel (%p2094_p12) target bundleno = 1794 (0x702), region = 80 }
 0x630   : > { %v1598_v60 = vadd.f32 %v2248_v8, %v1453_v35  ;;  %v1569_v9 = vpop.f32.mrb[29].mxu0  ;;  %v1673_v8 = vld [vmem:[#allocation5 + $0x20] sm:$0xff] (!%p2094_p12) }
 0x631   : > { %v1596_v22 = vadd.f32 %v1569_v9, %v1451_v1  ;;  %v2249_v7 = vpop.f32.mrb[30].mxu0 }
 0x632   : > { %1614 = vst.msk [vmem:[#allocation5 + $0x70] sm:$0xff] %vm711_vm4, %v1598_v60  ;;  %v1599_v28 = vadd.f32 %v2249_v7, %v1454_v41  ;;  %v1572_v3 = vpop.f32.mrb[31].mxu0  ;;  %v1674_v7 = vld [vmem:[#allocation5 + $0x28] sm:$0xff] (!%p2094_p12) }
 0x633   : > { %1612 = vst.msk [vmem:[#allocation5 + $0x60] sm:$0xff] %vm711_vm4, %v1596_v22  ;;  %v1597_v29 = vadd.f32 %v1572_v3, %v1452_v34  ;;  %v1801_v22 = vld [vmem:[%s3283_s24 + $0x18] sm:$0xff] (!%p2094_p12) }
 0x634   : > { %1615 = vst.msk [vmem:[#allocation5 + $0x78] sm:$0xff] %vm711_vm4, %v1599_v28 }
 0x635   : > { %1613 = vst.msk [vmem:[#allocation5 + $0x68] sm:$0xff] %vm711_vm4, %v1597_v29 }
 0x673   : > { %v1698_v20 = vpop.permute.xlu1 %1697 }
 0x674   : > { %v1767_v54 = vmul.f32 %v1698_v20, %v1671_v31  ;;  %v1808_v20 = vld [vmem:[%s3283_s24 + $0x50] sm:$0xff] }
 0x676   : > { %v1784_v6 = vmul.f32 %v3851_v62, %v1767_v54 }
 0x678   : > { %v1816_v60 = vadd.f32 %v1800_v55, %v1784_v6  ;;  %v1810_v55 = vld [vmem:[%s3283_s24 + $0x60] sm:$0xff] }
 0x679   : > { %v1688_v16 = vpop.permute.xlu0 %1687 }
 0x67a   : > { %v1765_v49 = vmul.f32 %v1688_v16, %v1669_v13  ;;  %v1703_v63 = vpop.permute.xlu1 %1702 }
 0x67b   : > { %v1768_v35 = vmul.f32 %v1703_v63, %v1672_v27  ;;  %v1683_v63 = vld [vmem:[#allocation5 + $0x70] sm:$0xff] }
 0x67c   : > { %v1782_v37 = vmul.f32 %v3851_v62, %v1765_v49 }
 0x67d   : > { %v1693_v44 = vpop.permute.xlu0 %1692  ;;  %v1785_v9 = vmul.f32 %v3851_v62, %v1768_v35 }
 0x67e   : > { %v1766_v18 = vmul.f32 %v1693_v44, %v1670_v52  ;;  %v1814_v57 = vadd.f32 %v1798_v51, %v1782_v37  ;;  %v1713_v28 = vpop.permute.xlu1 %1712  ;;  %v1681_v52 = vld [vmem:[#allocation5 + $0x60] sm:$0xff] }
 0x67f   : > { %v1817_v3 = vadd.f32 %v1801_v22, %v1785_v9  ;;  %v1770_v29 = vmul.f32 %v1713_v28, %v1674_v7  ;;  %v1684_v9 = vld [vmem:[#allocation5 + $0x78] sm:$0xff] }
 0x680   : > { %v1783_v48 = vmul.f32 %v3851_v62, %v1766_v18  ;;  %1830 = vxpose.xlu0.b32.start [1/16] (narrow) %v1814_v57, 8  ;;  %v1809_v18 = vld [vmem:[%s3283_s24 + $0x58] sm:$0xff]  ;;  %v1682_v57 = vld [vmem:[#allocation5 + $0x68] sm:$0xff] }
 0x681   : > { %v1708_v41 = vpop.permute.xlu0 %1707  ;;  %v1787_v56 = vmul.f32 %v3851_v62, %v1770_v29 }
 0x682   : > { %v1815_v1 = vadd.f32 %v1799_v19, %v1783_v48  ;;  %v1769_v34 = vmul.f32 %v1708_v41, %v1673_v8  ;;  %v1723_v50 = vpop.permute.xlu1 %1722 }
 0x683   : > { %v1819_v14 = vadd.f32 %v1803_v11, %v1787_v56  ;;  %v1772_v61 = vmul.f32 %v1723_v50, %v1676_v21 }
 0x684   : > { %1831 = vxpose.xlu0.b32.cont [2/16] (narrow) %v1815_v1, 8  ;;  %v1786_v59 = vmul.f32 %v3851_v62, %v1769_v34 }
 0x685   : > { %v1718_v42 = vpop.permute.xlu0 %1717  ;;  %v1789_v43 = vmul.f32 %v3851_v62, %v1772_v61 }
 0x686   : > { %v1818_v53 = vadd.f32 %v1802_v25, %v1786_v59  ;;  %v1771_v26 = vmul.f32 %v1718_v42, %v1675_v10  ;;  %v1733_v0 = vpop.permute.xlu1 %1732  ;;  %v1813_v25 = vld [vmem:[%s3283_s24 + $0x78] sm:$0xff] }
 0x687   : > { %v1821_v12 = vadd.f32 %v1805_v40, %v1789_v43  ;;  %v1774_v45 = vmul.f32 %v1733_v0, %v1678_v38 }
 0x688   : > { %1832 = vxpose.xlu0.b32.cont [3/16] (narrow) %v1816_v60, 8  ;;  %v1788_v39 = vmul.f32 %v3851_v62, %v1771_v26  ;;  %v1811_v60 = vld [vmem:[%s3283_s24 + $0x68] sm:$0xff] }
 0x689   : > { %v1728_v32 = vpop.permute.xlu0 %1727  ;;  %v1791_v24 = vmul.f32 %v3851_v62, %v1774_v45 }
 0x68a   : > { %v1820_v23 = vadd.f32 %v1804_v58, %v1788_v39  ;;  %v1773_v36 = vmul.f32 %v1728_v32, %v1677_v33  ;;  %v1743_v13 = vpop.permute.xlu1 %1742 }
 0x68b   : > { %v1823_v31 = vadd.f32 %v1807_v47, %v1791_v24  ;;  %v1776_v16 = vmul.f32 %v1743_v13, %v1680_v2 }
 0x68c   : > { %1833 = vxpose.xlu0.b32.cont [4/16] (narrow) %v1817_v3, 8  ;;  %v1790_v15 = vmul.f32 %v3851_v62, %v1773_v36  ;;  %v1812_v3 = vld [vmem:[%s3283_s24 + $0x70] sm:$0xff] }
 0x68d   : > { %v1738_v46 = vpop.permute.xlu0 %1737  ;;  %v1793_v54 = vmul.f32 %v3851_v62, %v1776_v16 }
 0x68e   : > { %v1822_v4 = vadd.f32 %v1806_v17, %v1790_v15  ;;  %v1775_v5 = vmul.f32 %v1738_v46, %v1679_v30  ;;  %v1753_v27 = vpop.permute.xlu1 %1752 }
 0x68f   : > { %v1825_v19 = vadd.f32 %v1809_v18, %v1793_v54  ;;  %v1778_v6 = vmul.f32 %v1753_v27, %v1682_v57 }
 0x690   : > { %1834 = vxpose.xlu0.b32.cont [5/16] (narrow) %v1818_v53, 8  ;;  %v1792_v49 = vmul.f32 %v3851_v62, %v1775_v5 }
 0x691   : > { %v1748_v51 = vpop.permute.xlu0 %1747  ;;  %v1795_v1 = vmul.f32 %v3851_v62, %v1778_v6 }
 0x692   : > { %v1824_v37 = vadd.f32 %v1808_v20, %v1792_v49  ;;  %v1777_v44 = vmul.f32 %v1748_v51, %v1681_v52  ;;  %v1763_v34 = vpop.permute.xlu1 %1762 }
 0x693   : > { %v1827_v22 = vadd.f32 %v1811_v60, %v1795_v1  ;;  %v1780_v7 = vmul.f32 %v1763_v34, %v1684_v9 }
 0x694   : > { %1835 = vxpose.xlu0.b32.cont [6/16] (narrow) %v1819_v14, 8  ;;  %v1794_v48 = vmul.f32 %v3851_v62, %v1777_v44 }
 0x695   : > { %v1758_v35 = vpop.permute.xlu0 %1757  ;;  %v1797_v29 = vmul.f32 %v3851_v62, %v1780_v7 }
 0x696   : > { %v1826_v8 = vadd.f32 %v1810_v55, %v1794_v48  ;;  %v1779_v41 = vmul.f32 %v1758_v35, %v1683_v63 }
 0x697   : > { %v1829_v10 = vadd.f32 %v1813_v25, %v1797_v29 }
 0x698   : > { %1836 = vxpose.xlu0.b32.cont [7/16] (narrow) %v1820_v23, 8  ;;  %v1796_v28 = vmul.f32 %v3851_v62, %v1779_v41 }
 0x69a   : > { %v1828_v59 = vadd.f32 %v1812_v3, %v1796_v28 }
 0x69c   : > { %1837 = vxpose.xlu0.b32.cont [8/16] (narrow) %v1821_v12, 8 }
 0x6a0   : > { %1838 = vxpose.xlu0.b32.cont [9/16] (narrow) %v1822_v4, 8 }
 0x6a4   : > { %1839 = vxpose.xlu0.b32.cont [10/16] (narrow) %v1823_v31, 8 }
 0x6a8   : > { %1840 = vxpose.xlu0.b32.cont [11/16] (narrow) %v1824_v37, 8 }
 0x6ac   : > { %1841 = vxpose.xlu0.b32.cont [12/16] (narrow) %v1825_v19, 8 }
 0x6b0   : > { %1842 = vxpose.xlu0.b32.cont [13/16] (narrow) %v1826_v8, 8 }
 0x6b4   : > { %1843 = vxpose.xlu0.b32.cont [14/16] (narrow) %v1827_v22, 8 }
 0x6b8   : > { %1844 = vxpose.xlu0.b32.cont [15/16] (narrow) %v1828_v59, 8 }
 0x6bc   : > { %1845 = vxpose.xlu0.b32.end [16/16] (narrow) %v1829_v10, 8 }
 0x700   : > { %v1846_v42 = vpop.trf.xlu0 }
 0x701   : > { %1862 = vst [vmem:[%s3310_s2] sm:$0xff] %v1846_v42 }
 0x702 PF: > { %s4027_s26 = sld [smem:[#allocation28_spill]]  ;;  %s4028_s16 = sld [smem:[#allocation27_spill]] }
 0x703   : > { %s4029_s22 = sld [smem:[#allocation32_spill]]  ;;  %s1879_s17 = sshll.u32 %s3310_s2, 4  ;;  %s3889_s17 = int_to_ptr.vmem [resolvable:$true] %s1879_s17 }
 0x704   : > { %s4030_s24 = sld [smem:[#allocation38_spill]]  ;;  %s1864_s25 = scalar_lea.sflag [#allocation9], %s3279_s7 }
 0x705   : > { %s2716_s20 = scalar_lea.vmem %s3889_s17, 128  ;;  %s2887_s15 = smov [#allocation18]  }
 0x706   : > { %p2717_p1 = scmp.ne.s32.totalorder %s3889_s17, %s2716_s20  ;;  %s2720_s19 = sshll.u32 %s2887_s15, 4  ;;  %s2721_s19 = int_to_ptr.vmem [resolvable:$false] %s2720_s19 }
 0x707   : > { %s2722_s2 = scalar_lea.vmem %s2721_s19, 256  ;;  %p2723_p10 = scmp.lt.s32.totalorder %s3889_s17, %s2721_s19 }
 0x708   : > { %s2096_s10 = sshll.u32 %s4027_s26, 1  ;;  %p2724_p2 = scmp.lt.s32.totalorder %s2722_s2, %s2716_s20 }
 0x709   : > { %s1875_s23 = sadd.s32 %s4028_s16, %s2096_s10  ;;  %p4031_p0 = scmp.ne.s32.totalorder %s4029_s22, 0 }
 0x70a   : > { %s2097_s21 = sshll.u32 %s1875_s23, 7  ;;  %p2725_p5 = por %p2724_p2, %p2723_p10 }
 0x70b   : > { %s1877_s9 = scalar_lea.hbm %s4030_s24, %s2097_s21  ;;  %p2718_p3 = pnand %p2717_p1, %p4031_p0 }
 0x70d   : > { %p2719_p4 = pneg %p2718_p3 }
 0x70f   : > { %p2726_p11 = pnand %p2725_p5, %p2719_p4 }
 0x711   : > { %2729 = shalt.err (!%p2726_p11)
}
 0x712   : > { %s2730_s5 = scalar_lea.hbm %s1877_s9, 128  ;;  %s2734_s16 = scalar_lea.hbm %s4030_s24, 512 }
 0x713   : > { %p2731_p6 = scmp.ne.s32.totalorder %s1877_s9, %s2730_s5  ;;  %p2735_p9 = scmp.lt.u32.totalorder %s1877_s9, %s4030_s24 }
 0x714   : > { %p2736_p8 = scmp.lt.u32.totalorder %s2734_s16, %s2730_s5  ;;  %p2738_p1 = scmp.lt.u32.totalorder %s2730_s5, %s1877_s9 }
 0x715   : > { %p2732_p13 = pnand %p2731_p6, %p4031_p0 }
 0x716   : > { %p2737_p12 = por %p2736_p8, %p2735_p9 }
 0x717   : > { %p2733_p7 = pneg %p2732_p13 }
 0x718   : > { %p2739_p3 = por %p2738_p1, %p2737_p12 }
 0x71a   : > { %p2740_p4 = pnand %p2739_p3, %p2733_p7 }
 0x71c   : > { %2743 = shalt.err (!%p2740_p4)
}
 0x71d   : > { %2283 = dma.vmem_to_hbm [thread:$0]  (%p4031_p0), %s3889_s17, 128, %s1877_s9, %s1864_s25  }
 0x71e PF: > { %s4032_s21 = sld [smem:[#allocation25_spill]]  ;;  %p2318_p10 = scmp.ge.s32.totalorder %s2870_s14, 2 }
 0x71f   : > { %p4033_p2 = scmp.ne.s32.totalorder %s4009_s6, 0 }
 0x721   : > { %p2306_p5 = pnand %p2318_p10, %p4033_p2 }
 0x724   : > { %s1891_s29 = sand.u32 1, %s4032_s21  }
 0x725   : > { %s1892_s3 = scalar_lea.sflag [#allocation9], %s1891_s29 }
 0x726   : > { %2817 = dma.done.wait (!%p2306_p5), %s1892_s3, 128  }
 0x727   : > { %2819 = vsyncadd (!%p2306_p5), %s1892_s3, 4294967168  ;;  %s29_s14 = sadd.s32 1, %s2870_s14   ;;  %s4035_s22 = sld [smem:[#allocation30_spill]] }
 0x728   : > { %p3916_p11 = scmp.ge.s32.totalorder %s29_s14, 10   ;;  %s4036_s17 = sld [smem:[#allocation31_spill]] }
 0x729   : > { %s4037_s26 = smov %s2826_s27  ;;  %s4038_s27 = smov %s2830_s28 }
 0x72a   : > { %s4039_s28 = smov %s3234_s0  ;;  %s4040_s29 = smov %s2838_s30 }
 0x72b   : > { %s4041_s30 = smov %s2842_s8  ;;  %s4042_s8 = smov %s3172_s4 }
 0x72c   : > { %s4043_s6 = smov %s2858_s11  ;;  %s4044_s9 = smov %s2862_s12 }
 0x72d   : > { %s4045_s10 = smov %s2866_s13  ;;  %s4046_s11 = smov %s4035_s22 }
 0x72e   : > { %s4047_s12 = smov %s4036_s17  ;;  %s4048_s13 = smov %s4058_s18 }
 0x72f   :  { %28 = sbr.rel (!%p3916_p11) target bundleno = 22 (0x16), region = 130 }
 0x736   :  { %1897 = vsyncpa [#allocation8], 1 }
 0x737   :  { %1899 = vsyncpa [#allocation8 + $0x1], 1 }
 0x738   :  { %1900 = vsyncpa [#allocation11], 1 }
 0x739   :  { %1902 = vsyncpa [#allocation11 + $0x1], 1 }
 0x73a   :  { %1903 = vsyncpa [#allocation14], 1 }
 0x73b   :  { %1904 = vsyncpa [#allocation17], 1 }
 0x73c   :  { %1905 = vsyncpa [#allocation9], 1 }
 0x73d   :  { %1907 = vsyncpa [#allocation9 + $0x1], 1 }

</bundles_post_ra>
